<compile_context>
chip_gen: v6e
topology: v6e:2x2x1
jax: 0.10.0
libtpu: 0.0.40
codegen_flags: <defaults>
</compile_context>

<pallas_src>
import functools

import numpy as np

import jax
import jax.numpy as jnp
from jax import lax
from jax.experimental import pallas as pl
from jax.experimental.pallas import tpu as pltpu


# ----------------------------------------------------------------------------
# Fused kernel: clamp -> cnn0 -> lrelu -> cnn1 -> lrelu -> cnn2 -> lrelu
#               -> cnn3 (ConvTranspose2d, subpixel-packed), all in VMEM.
#
# Activation slab (scratch): row i holds 4 adjacent padded columns x 32 ch
# (= 128 lanes) of one half-res spatial row; row pitch = Wg groups/row; a conv
# tap (ky, gx) is the contiguous slice  slab[ky*Wg + gx + 1 : ... + L0, :].
# ----------------------------------------------------------------------------
def _head_kernel(x_ref, w0_ref, w1_ref, w2_ref, w3_ref,
                 b0_ref, b1_ref, b2_ref, b3_ref,
                 o_ref, act_scr, *, H2, W2, Wg):
    L0 = H2 * Wg
    fringe = Wg + 1
    lp_act = L0 + 2 * Wg + 2

    # Zero only the pad fringe (top/bottom pad rows); the data region --
    # including the pad/slack columns inside it -- is fully rewritten by every
    # write_back below, so no full-slab clear is needed.
    act_scr[0:fringe, :] = jnp.zeros((fringe, 128), jnp.bfloat16)
    act_scr[lp_act - fringe:lp_act, :] = jnp.zeros((fringe, 128), jnp.bfloat16)

    # In-kernel junk-column mask (replaces the old HBM (L0,1) f32 mask input).
    # Row i holds padded columns 4*(i % Wg) + lane//32; valid columns are
    # 1..W2.  (i % Wg) is computed with exact f32 arithmetic (rows << 2^24 and
    # |rounding err| << 0.5/Wg), avoiding vector integer div/rem.
    rowf = lax.broadcasted_iota(jnp.int32, (L0, 128), 0).astype(jnp.float32)
    lanef = lax.broadcasted_iota(jnp.int32, (L0, 128), 1).astype(jnp.float32)
    gidx = rowf - Wg * jnp.floor((rowf + 0.5) * (1.0 / Wg))
    col = 4.0 * gidx + jnp.floor(lanef * (1.0 / 32.0))
    valid = jnp.logical_and(col > 0.5, col < W2 + 0.5)

    def lrelu(v):
        return jnp.where(v >= 0.0, v, 0.2 * v)

    def conv(src_ref, w_ref, offs, k, clamp=False):
        # Sum of per-tap matmuls over contiguous slab slices; keep the
        # accumulation chain contiguous so v7x can accumulate in the MRB.
        acc = jnp.zeros((L0, 128), jnp.float32)
        for t, off in enumerate(offs):                      # static offsets
            lhs = src_ref[off:off + L0, :]
            if clamp:                                       # fused x.clamp(0,1)
                lhs = jnp.clip(lhs, 0.0, 1.0)
            rhs = w_ref[t * k:(t + 1) * k, :]
            acc = acc + jnp.dot(lhs, rhs, preferred_element_type=jnp.float32)
        return acc

    def write_back(y):
        # Junk (pad/slack) columns are zeroed so the next layer's pad reads
        # stay exact; valid columns land at their padded slab locations.
        act_scr[fringe:fringe + L0, :] = jnp.where(valid, y, 0.0).astype(jnp.bfloat16)

    offs0 = (0, 1, Wg, Wg + 1)                               # (dy, gx) taps
    offs3 = tuple(ky * Wg + gx + 1 for ky in range(3) for gx in (-1, 0, 1))

    # cnn0 (3x3 stride-2 == 2x2-tap conv over the space-to-depth input) + lrelu
    write_back(lrelu(conv(x_ref, w0_ref, offs0, 48, clamp=True) + b0_ref[...]))
    # cnn1, cnn2 + lrelu
    write_back(lrelu(conv(act_scr, w1_ref, offs3, 128) + b1_ref[...]))
    write_back(lrelu(conv(act_scr, w2_ref, offs3, 128) + b2_ref[...]))
    # cnn3: ConvTranspose2d(32,8,4,2,1) as a 3x3 conv whose output lanes are
    # (j, qy, qx, co) subpixel-packed.  Junk columns are dropped by the wrapper.
    o_ref[...] = (conv(act_scr, w3_ref, offs3, 128) + b3_ref[...]).astype(jnp.bfloat16)


# ----------------------------------------------------------------------------
# Wrapper: layout plumbing only (space-to-depth, lane-group packing, unpack).
# ----------------------------------------------------------------------------
@jax.jit
def head_forward(x_nchw, params):
    N, C, H, W = x_nchw.shape
    assert C == 3 and H % 2 == 0 and W % 2 == 0
    H2, W2 = H // 2, W // 2
    Wg = -(-(W2 + 2) // 4)            # 4-column groups per padded row
    L0 = H2 * Wg
    lp_in = (H2 + 1) * Wg + 1
    lp_act = L0 + 2 * Wg + 2

    # NCHW -> NHWC -> space-to-depth(2): 12 channels (py, px, ci); then pack
    # 4 adjacent s2d columns per slab row (48 lanes); input group u holds s2d
    # columns 4u-2 .. 4u+1 (2 left-pad cols), one zero s2d row on top.
    x = jnp.transpose(x_nchw, (0, 2, 3, 1)).astype(jnp.float32)
    z = x.reshape(N, H2, 2, W2, 2, 3).transpose(0, 1, 3, 2, 4, 5)
    z = z.reshape(N, H2, W2, 12)
    z = jnp.pad(z, ((0, 0), (1, 1), (2, 4 * Wg - 2 - W2), (0, 0)))
    z = z.reshape(N, H2 + 2, Wg, 48).reshape(N, (H2 + 2) * Wg, 48)
    xz = z[:, :lp_in, :].astype(jnp.bfloat16)

    # Rough per-frame VMEM footprint -> explicit scoped-VMEM limit w/ headroom.
    est = (2 * lp_in + 2 * L0 + lp_act + 2 * (192 + 3 * 1152)) * 128 * 2 \
          + 3 * L0 * 128 * 4
    vmem_limit = int(min(max(2 * est, 32 * 2**20), 56 * 2**20))

    kernel = functools.partial(_head_kernel, H2=H2, W2=W2, Wg=Wg)
    rep = lambda n: (0, 0)
    out = pl.pallas_call(
        kernel,
        out_shape=jax.ShapeDtypeStruct((N, L0, 128), jnp.bfloat16),
        grid=(N,),
        in_specs=[
            pl.BlockSpec((None, lp_in, 48), lambda n: (n, 0, 0)),   # packed input
            pl.BlockSpec((4 * 48, 128), rep),                       # w0 taps
            pl.BlockSpec((9 * 128, 128), rep),                      # w1 taps
            pl.BlockSpec((9 * 128, 128), rep),                      # w2 taps
            pl.BlockSpec((9 * 128, 128), rep),                      # w3 taps (deconv)
            pl.BlockSpec((1, 128), rep),                            # b0 (x4 lanes)
            pl.BlockSpec((1, 128), rep),                            # b1
            pl.BlockSpec((1, 128), rep),                            # b2
            pl.BlockSpec((1, 128), rep),                            # b3 (packed)
        ],
        out_specs=pl.BlockSpec((None, L0, 128), lambda n: (n, 0, 0)),
        scratch_shapes=[pltpu.VMEM((lp_act, 128), jnp.bfloat16)],   # activation slab
        compiler_params=pltpu.CompilerParams(
            dimension_semantics=("parallel",),      # batch shards across TCs (v7x)
            vmem_limit_bytes=vmem_limit,
        ),
    )(xz, params["w0p"], params["w1p"], params["w2p"], params["w3p"],
      params["b0p"], params["b1p"], params["b2p"], params["b3p"])

    # (N, L0, 128) -> (N, 8, H, W).  Lane = (j, qy, qx, co); slab row (r, g)
    # holds padded columns 4g+j; valid padded columns are 1..W2 (junk dropped).
    y = out.reshape(N, H2, Wg, 4, 2, 2, 8).reshape(N, H2, 4 * Wg, 2, 2, 8)
    y = y[:, :, 1:W2 + 1]
    y = y.transpose(0, 5, 1, 3, 2, 4).reshape(N, 8, H, W)
    return y.astype(jnp.float32)


# ----------------------------------------------------------------------------
# Parameters (deterministic synthetic init) + lane-packed weight packing.
# ----------------------------------------------------------------------------
def _bf16_round(a):
    return jnp.asarray(a, jnp.bfloat16).astype(jnp.float32)


_KMAP = {(0, 1): 0, (1, 0): 1, (1, 1): 2}        # (2x2 tap d, s2d parity) -> 3x3 k
_ROWMAP = {0: [(0, 3)], 1: [(0, 1), (1, 2)], 2: [(1, 0)]}  # deconv tap -> (q, k)


def _pack_rhs_3x3(blocks):
    """blocks[ky, kx] = (32,32) (ci,co) tap matrix of a 3x3 stride-1 conv.
    Returns the lane-packed rhs (9*128, 128): taps ordered (ky, gx=-1..1);
    K-rows = (m = within-group input col, ci); N-cols = (j = within-group out
    col, co).  Output col 4g+j reads input col 4g + (j + kx - 1)."""
    rhs = np.zeros((3, 3, 4, 32, 4, 32), np.float32)
    for ky in range(3):
        for j in range(4):
            for kx in range(3):
                gx, m = divmod(j + kx - 1, 4)
                rhs[ky, gx + 1, m, :, j, :] = blocks[ky, kx]
    return rhs.reshape(9 * 128, 128)


def init_params(key):
    ks = jax.random.split(key, 8)
    scale = 0.1
    w0 = _bf16_round(scale * jax.random.normal(ks[0], (3, 3, 3, 32), jnp.float32))
    w1 = _bf16_round(scale * jax.random.normal(ks[1], (3, 3, 32, 32), jnp.float32))
    w2 = _bf16_round(scale * jax.random.normal(ks[2], (3, 3, 32, 32), jnp.float32))
    wt3 = _bf16_round(scale * jax.random.normal(ks[3], (32, 8, 4, 4), jnp.float32))
    b0 = scale * jax.random.normal(ks[4], (32,), jnp.float32)
    b1 = scale * jax.random.normal(ks[5], (32,), jnp.float32)
    b2 = scale * jax.random.normal(ks[6], (32,), jnp.float32)
    b3 = scale * jax.random.normal(ks[7], (8,), jnp.float32)

    w0n, w1n, w2n, wt3n = (np.asarray(a) for a in (w0, w1, w2, wt3))

    # cnn0: stride-2 3x3 conv == 2x2-tap conv over the space-to-depth(2) input.
    # Lane-packed rhs: taps (dy, gx in {0,1}); K-rows = (m, py, px, ci) = 48;
    # N-cols = (j, co) = 128.  Output padded col 4g+j (= un-padded 4g-1+j)
    # reads s2d column 4g + (j + dx - 2); input group g base col = 4g-2.
    w0p = np.zeros((2, 2, 4, 12, 4, 32), np.float32)
    for dy in range(2):
        for py in range(2):
            if (dy, py) not in _KMAP:
                continue
            ky = _KMAP[(dy, py)]
            for j in range(4):
                for dx in range(2):
                    gx, m = divmod(j + dx, 4)
                    for px in range(2):
                        if (dx, px) not in _KMAP:
                            continue
                        kx = _KMAP[(dx, px)]
                        ci0 = py * 6 + px * 3
                        w0p[dy, gx, m, ci0:ci0 + 3, j, :] = w0n[ky, kx]
    w0p = w0p.reshape(4 * 48, 128)

    w1p = _pack_rhs_3x3(w1n)
    w2p = _pack_rhs_3x3(w2n)

    # cnn3: ConvTranspose2d(32, 8, 4, 2, 1) == 3x3 conv over the padded
    # half-res activations whose 32 output channels are subpixel-packed
    # (qy, qx, co); per-tap (ky, kx) 32x32 block built via _ROWMAP.
    blk3 = np.zeros((3, 3, 32, 32), np.float32)
    for oy, lys in _ROWMAP.items():
        for ox, lxs in _ROWMAP.items():
            for qy, kh in lys:
                for qx, kw in lxs:
                    c0 = qy * 16 + qx * 8
                    blk3[oy, ox, :, c0:c0 + 8] = wt3n[:, :, kh, kw]
    w3p = _pack_rhs_3x3(blk3)

    # Reference (lax) ConvTranspose weights: flipped, in/out swapped HWIO.
    w3_hwio = jnp.flip(wt3, axis=(2, 3)).transpose(2, 3, 0, 1)   # (4,4,32,8)

    as_bf16 = lambda a: jnp.asarray(a, jnp.bfloat16)
    lane_bias = lambda b: jnp.tile(b, 128 // b.shape[0]).reshape(1, 128).astype(jnp.float32)
    return {
        "w0_hwio": w0, "w1_hwio": w1, "w2_hwio": w2, "w3_hwio": w3_hwio,
        "w0p": as_bf16(w0p), "w1p": as_bf16(w1p),
        "w2p": as_bf16(w2p), "w3p": as_bf16(w3p),
        "b0": b0, "b1": b1, "b2": b2, "b3": b3,
        "b0p": lane_bias(b0), "b1p": lane_bias(b1),
        "b2p": lane_bias(b2), "b3p": lane_bias(b3),
    }


# ----------------------------------------------------------------------------
# Pure-JAX reference (lax convs) for numerical validation.
# ----------------------------------------------------------------------------
def head_reference(x_nchw, params):
    dn = ("NHWC", "HWIO", "NHWC")
    lrelu = lambda v: jnp.where(v >= 0, v, 0.2 * v)
    x = jnp.transpose(x_nchw, (0, 2, 3, 1)).astype(jnp.float32)
    x = jnp.clip(x, 0.0, 1.0)
    y = lax.conv_general_dilated(x, params["w0_hwio"], (2, 2), [(1, 1), (1, 1)],
                                 dimension_numbers=dn) + params["b0"]
    y = lrelu(y)
    y = lax.conv_general_dilated(y, params["w1_hwio"], (1, 1), [(1, 1), (1, 1)],
                                 dimension_numbers=dn) + params["b1"]
    y = lrelu(y)
    y = lax.conv_general_dilated(y, params["w2_hwio"], (1, 1), [(1, 1), (1, 1)],
                                 dimension_numbers=dn) + params["b2"]
    y = lrelu(y)
    y = lax.conv_general_dilated(y, params["w3_hwio"], (1, 1), [(2, 2), (2, 2)],
                                 lhs_dilation=(2, 2), dimension_numbers=dn) + params["b3"]
    return jnp.transpose(y, (0, 3, 1, 2))


if __name__ == "__main__":
    key = jax.random.PRNGKey(0)
    kx, kp = jax.random.split(key)
    # Small NCHW input consistent with Head (3 input channels).
    x = jax.random.uniform(kx, (2, 3, 16, 16), jnp.float32, minval=-0.2, maxval=1.2)
    x = x.astype(jnp.bfloat16).astype(jnp.float32)   # bf16-representable test input
    params = init_params(kp)

    out = jax.block_until_ready(head_forward(x, params))
    assert out.shape == (2, 8, 16, 16), out.shape

    ref = jax.block_until_ready(head_reference(x, params))
    err = float(jnp.max(jnp.abs(out - ref)))
    # bf16 dot inputs / bf16 intermediate activations & output (f32 MXU accum).
    assert jnp.allclose(out, ref, atol=2e-2, rtol=2e-2), err

    print("KERNEL_OK")
</pallas_src>

<mosaic_0001>
module attributes {stable_mosaic.version = 11 : i64} {
  func.func @_head_kernel(%arg0: i32, %arg1: memref<1x28x48xbf16, #tpu.memory_space<vmem>>, %arg2: memref<192x128xbf16, #tpu.memory_space<vmem>>, %arg3: memref<1152x128xbf16, #tpu.memory_space<vmem>>, %arg4: memref<1152x128xbf16, #tpu.memory_space<vmem>>, %arg5: memref<1152x128xbf16, #tpu.memory_space<vmem>>, %arg6: memref<1x128xf32, #tpu.memory_space<vmem>>, %arg7: memref<1x128xf32, #tpu.memory_space<vmem>>, %arg8: memref<1x128xf32, #tpu.memory_space<vmem>>, %arg9: memref<1x128xf32, #tpu.memory_space<vmem>>, %arg10: memref<1x24x128xbf16, #tpu.memory_space<vmem>>, %arg11: memref<32x128xbf16, #tpu.memory_space<vmem>>) attributes {dimension_semantics = [#tpu.dimension_semantics<parallel>], iteration_bounds = array<i64: 2>, scalar_prefetch = 0 : i64, scratch_operands = 1 : i64, tpu.core_type = #tpu.core_type<tc>, window_params = [{transform_indices = @transform_0, window_bounds = array<i64: 1, 28, 48>}, {pipeline_mode = #tpu.pipeline_mode<synchronous>, transform_indices = @transform_1, window_bounds = array<i64: 192, 128>}, {pipeline_mode = #tpu.pipeline_mode<synchronous>, transform_indices = @transform_2, window_bounds = array<i64: 1152, 128>}, {pipeline_mode = #tpu.pipeline_mode<synchronous>, transform_indices = @transform_3, window_bounds = array<i64: 1152, 128>}, {pipeline_mode = #tpu.pipeline_mode<synchronous>, transform_indices = @transform_4, window_bounds = array<i64: 1152, 128>}, {pipeline_mode = #tpu.pipeline_mode<synchronous>, transform_indices = @transform_5, window_bounds = array<i64: 1, 128>}, {pipeline_mode = #tpu.pipeline_mode<synchronous>, transform_indices = @transform_6, window_bounds = array<i64: 1, 128>}, {pipeline_mode = #tpu.pipeline_mode<synchronous>, transform_indices = @transform_7, window_bounds = array<i64: 1, 128>}, {pipeline_mode = #tpu.pipeline_mode<synchronous>, transform_indices = @transform_8, window_bounds = array<i64: 1, 128>}, {transform_indices = @transform_9, window_bounds = array<i64: 1, 24, 128>}]} {
    %cst = arith.constant 0.000000e+00 : bf16
    %0 = vector.broadcast %cst : bf16 to vector<4x128xbf16>
    %c0 = arith.constant 0 : index
    %c0_0 = arith.constant 0 : index
    %1 = vector.load %arg11[%c0, %c0_0] : memref<32x128xbf16, #tpu.memory_space<vmem>>, vector<4x128xbf16>
    tpu.vector_store %arg11[%c0, %c0_0], %0 {strides = array<i32>} : memref<32x128xbf16, #tpu.memory_space<vmem>>, vector<4x128xbf16>,
    %cst_1 = arith.constant 0.000000e+00 : bf16
    %2 = vector.broadcast %cst_1 : bf16 to vector<4x128xbf16>
    %c28 = arith.constant 28 : index
    %c0_2 = arith.constant 0 : index
    %3 = vector.load %arg11[%c28, %c0_2] : memref<32x128xbf16, #tpu.memory_space<vmem>>, vector<4x128xbf16>
    tpu.vector_store %arg11[%c28, %c0_2], %2 {strides = array<i32>} : memref<32x128xbf16, #tpu.memory_space<vmem>>, vector<4x128xbf16>,
    %4 = tpu.iota {dimensions = array<i32: 0>} : vector<24x128xi32>
    %5 = arith.sitofp %4 : vector<24x128xi32> to vector<24x128xf32>
    %6 = tpu.iota {dimensions = array<i32: 1>} : vector<24x128xi32>
    %7 = arith.sitofp %6 : vector<24x128xi32> to vector<24x128xf32>
    %cst_3 = arith.constant 5.000000e-01 : f32
    %8 = vector.broadcast %cst_3 : f32 to vector<24x128xf32>
    %9 = arith.addf %5, %8 : vector<24x128xf32>
    %cst_4 = arith.constant 0.333333343 : f32
    %10 = vector.broadcast %cst_4 : f32 to vector<24x128xf32>
    %11 = arith.mulf %9, %10 : vector<24x128xf32>
    %12 = math.floor %11 : vector<24x128xf32>
    %cst_5 = arith.constant 3.000000e+00 : f32
    %13 = vector.broadcast %cst_5 : f32 to vector<24x128xf32>
    %14 = arith.mulf %13, %12 : vector<24x128xf32>
    %15 = arith.subf %5, %14 : vector<24x128xf32>
    %cst_6 = arith.constant 4.000000e+00 : f32
    %16 = vector.broadcast %cst_6 : f32 to vector<24x128xf32>
    %17 = arith.mulf %16, %15 : vector<24x128xf32>
    %cst_7 = arith.constant 3.125000e-02 : f32
    %18 = vector.broadcast %cst_7 : f32 to vector<24x128xf32>
    %19 = arith.mulf %7, %18 : vector<24x128xf32>
    %20 = math.floor %19 : vector<24x128xf32>
    %21 = arith.addf %17, %20 : vector<24x128xf32>
    %cst_8 = arith.constant 5.000000e-01 : f32
    %22 = vector.broadcast %cst_8 : f32 to vector<24x128xf32>
    %23 = arith.cmpf ogt, %21, %22 : vector<24x128xf32>
    %cst_9 = arith.constant 8.500000e+00 : f32
    %24 = vector.broadcast %cst_9 : f32 to vector<24x128xf32>
    %25 = arith.cmpf olt, %21, %24 : vector<24x128xf32>
    %26 = arith.andi %23, %25 : vector<24x128xi1>
    %cst_10 = arith.constant 0.000000e+00 : f32
    %27 = vector.broadcast %cst_10 : f32 to vector<24x128xf32>
    %c0_11 = arith.constant 0 : index
    %c0_12 = arith.constant 0 : index
    %c0_13 = arith.constant 0 : index
    %28 = vector.load %arg1[%c0_11, %c0_12, %c0_13] : memref<1x28x48xbf16, #tpu.memory_space<vmem>>, vector<1x24x48xbf16>
    %29 = vector.shape_cast %28 : vector<1x24x48xbf16> to vector<24x48xbf16>
    %cst_14 = arith.constant 0.000000e+00 : f32
    %cst_15 = arith.constant 1.000000e+00 : f32
    %30 = arith.truncf %cst_14 : f32 to bf16
    %31 = vector.broadcast %30 : bf16 to vector<24x48xbf16>
    %32 = arith.maximumf %31, %29 : vector<24x48xbf16>
    %33 = arith.truncf %cst_15 : f32 to bf16
    %34 = vector.broadcast %33 : bf16 to vector<24x48xbf16>
    %35 = arith.minimumf %34, %32 : vector<24x48xbf16>
    %c0_16 = arith.constant 0 : index
    %c0_17 = arith.constant 0 : index
    %36 = vector.load %arg2[%c0_16, %c0_17] : memref<192x128xbf16, #tpu.memory_space<vmem>>, vector<48x128xbf16>
    %cst_18 = arith.constant dense<0.000000e+00> : vector<24x128xf32>
    %37 = tpu.matmul %35, %36, %cst_18 {dimension_numbers = #tpu.dot_dimension_numbers<[1], [0], [0], [1], [0, 0, 1, 1], [], []>} : vector<24x48xbf16>, vector<48x128xbf16>, vector<24x128xf32> -> vector<24x128xf32>
    %38 = arith.addf %27, %37 : vector<24x128xf32>
    %c0_19 = arith.constant 0 : index
    %c1 = arith.constant 1 : index
    %c0_20 = arith.constant 0 : index
    %39 = vector.load %arg1[%c0_19, %c1, %c0_20] : memref<1x28x48xbf16, #tpu.memory_space<vmem>>, vector<1x24x48xbf16>
    %40 = vector.shape_cast %39 : vector<1x24x48xbf16> to vector<24x48xbf16>
    %cst_21 = arith.constant 0.000000e+00 : f32
    %cst_22 = arith.constant 1.000000e+00 : f32
    %41 = arith.truncf %cst_21 : f32 to bf16
    %42 = vector.broadcast %41 : bf16 to vector<24x48xbf16>
    %43 = arith.maximumf %42, %40 : vector<24x48xbf16>
    %44 = arith.truncf %cst_22 : f32 to bf16
    %45 = vector.broadcast %44 : bf16 to vector<24x48xbf16>
    %46 = arith.minimumf %45, %43 : vector<24x48xbf16>
    %c48 = arith.constant 48 : index
    %c0_23 = arith.constant 0 : index
    %47 = vector.load %arg2[%c48, %c0_23] : memref<192x128xbf16, #tpu.memory_space<vmem>>, vector<48x128xbf16>
    %cst_24 = arith.constant dense<0.000000e+00> : vector<24x128xf32>
    %48 = tpu.matmul %46, %47, %cst_24 {dimension_numbers = #tpu.dot_dimension_numbers<[1], [0], [0], [1], [0, 0, 1, 1], [], []>} : vector<24x48xbf16>, vector<48x128xbf16>, vector<24x128xf32> -> vector<24x128xf32>
    %49 = arith.addf %38, %48 : vector<24x128xf32>
    %c0_25 = arith.constant 0 : index
    %c3 = arith.constant 3 : index
    %c0_26 = arith.constant 0 : index
    %50 = vector.load %arg1[%c0_25, %c3, %c0_26] : memref<1x28x48xbf16, #tpu.memory_space<vmem>>, vector<1x24x48xbf16>
    %51 = vector.shape_cast %50 : vector<1x24x48xbf16> to vector<24x48xbf16>
    %cst_27 = arith.constant 0.000000e+00 : f32
    %cst_28 = arith.constant 1.000000e+00 : f32
    %52 = arith.truncf %cst_27 : f32 to bf16
    %53 = vector.broadcast %52 : bf16 to vector<24x48xbf16>
    %54 = arith.maximumf %53, %51 : vector<24x48xbf16>
    %55 = arith.truncf %cst_28 : f32 to bf16
    %56 = vector.broadcast %55 : bf16 to vector<24x48xbf16>
    %57 = arith.minimumf %56, %54 : vector<24x48xbf16>
    %c96 = arith.constant 96 : index
    %c0_29 = arith.constant 0 : index
    %58 = vector.load %arg2[%c96, %c0_29] : memref<192x128xbf16, #tpu.memory_space<vmem>>, vector<48x128xbf16>
    %cst_30 = arith.constant dense<0.000000e+00> : vector<24x128xf32>
    %59 = tpu.matmul %57, %58, %cst_30 {dimension_numbers = #tpu.dot_dimension_numbers<[1], [0], [0], [1], [0, 0, 1, 1], [], []>} : vector<24x48xbf16>, vector<48x128xbf16>, vector<24x128xf32> -> vector<24x128xf32>
    %60 = arith.addf %49, %59 : vector<24x128xf32>
    %c0_31 = arith.constant 0 : index
    %c4 = arith.constant 4 : index
    %c0_32 = arith.constant 0 : index
    %61 = vector.load %arg1[%c0_31, %c4, %c0_32] : memref<1x28x48xbf16, #tpu.memory_space<vmem>>, vector<1x24x48xbf16>
    %62 = vector.shape_cast %61 : vector<1x24x48xbf16> to vector<24x48xbf16>
    %cst_33 = arith.constant 0.000000e+00 : f32
    %cst_34 = arith.constant 1.000000e+00 : f32
    %63 = arith.truncf %cst_33 : f32 to bf16
    %64 = vector.broadcast %63 : bf16 to vector<24x48xbf16>
    %65 = arith.maximumf %64, %62 : vector<24x48xbf16>
    %66 = arith.truncf %cst_34 : f32 to bf16
    %67 = vector.broadcast %66 : bf16 to vector<24x48xbf16>
    %68 = arith.minimumf %67, %65 : vector<24x48xbf16>
    %c144 = arith.constant 144 : index
    %c0_35 = arith.constant 0 : index
    %69 = vector.load %arg2[%c144, %c0_35] : memref<192x128xbf16, #tpu.memory_space<vmem>>, vector<48x128xbf16>
    %cst_36 = arith.constant dense<0.000000e+00> : vector<24x128xf32>
    %70 = tpu.matmul %68, %69, %cst_36 {dimension_numbers = #tpu.dot_dimension_numbers<[1], [0], [0], [1], [0, 0, 1, 1], [], []>} : vector<24x48xbf16>, vector<48x128xbf16>, vector<24x128xf32> -> vector<24x128xf32>
    %71 = arith.addf %60, %70 : vector<24x128xf32>
    %c0_37 = arith.constant 0 : index
    %c0_38 = arith.constant 0 : index
    %72 = vector.load %arg6[%c0_37, %c0_38] : memref<1x128xf32, #tpu.memory_space<vmem>>, vector<1x128xf32>
    %73 = vector.broadcast %72 : vector<1x128xf32> to vector<24x128xf32>
    %74 = arith.addf %71, %73 : vector<24x128xf32>
    %cst_39 = arith.constant 0.000000e+00 : f32
    %75 = vector.broadcast %cst_39 : f32 to vector<24x128xf32>
    %76 = arith.cmpf oge, %74, %75 : vector<24x128xf32>
    %cst_40 = arith.constant 2.000000e-01 : f32
    %77 = vector.broadcast %cst_40 : f32 to vector<24x128xf32>
    %78 = arith.mulf %77, %74 : vector<24x128xf32>
    %79 = arith.select %76, %74, %78 : vector<24x128xi1>, vector<24x128xf32>
    %cst_41 = arith.constant 0.000000e+00 : f32
    %80 = vector.broadcast %cst_41 : f32 to vector<24x128xf32>
    %81 = arith.select %26, %79, %80 : vector<24x128xi1>, vector<24x128xf32>
    %82 = arith.truncf %81 : vector<24x128xf32> to vector<24x128xbf16>
    %c4_42 = arith.constant 4 : index
    %c0_43 = arith.constant 0 : index
    %83 = vector.load %arg11[%c4_42, %c0_43] : memref<32x128xbf16, #tpu.memory_space<vmem>>, vector<24x128xbf16>
    tpu.vector_store %arg11[%c4_42, %c0_43], %82 {strides = array<i32>} : memref<32x128xbf16, #tpu.memory_space<vmem>>, vector<24x128xbf16>,
    %cst_44 = arith.constant 0.000000e+00 : f32
    %84 = vector.broadcast %cst_44 : f32 to vector<24x128xf32>
    %c0_45 = arith.constant 0 : index
    %c0_46 = arith.constant 0 : index
    %85 = vector.load %arg11[%c0_45, %c0_46] : memref<32x128xbf16, #tpu.memory_space<vmem>>, vector<24x128xbf16>
    %c0_47 = arith.constant 0 : index
    %c0_48 = arith.constant 0 : index
    %86 = vector.load %arg3[%c0_47, %c0_48] : memref<1152x128xbf16, #tpu.memory_space<vmem>>, vector<128x128xbf16>
    %cst_49 = arith.constant dense<0.000000e+00> : vector<24x128xf32>
    %87 = tpu.matmul %85, %86, %cst_49 {dimension_numbers = #tpu.dot_dimension_numbers<[1], [0], [0], [1], [0, 0, 1, 1], [], []>} : vector<24x128xbf16>, vector<128x128xbf16>, vector<24x128xf32> -> vector<24x128xf32>
    %88 = arith.addf %84, %87 : vector<24x128xf32>
    %c1_50 = arith.constant 1 : index
    %c0_51 = arith.constant 0 : index
    %89 = vector.load %arg11[%c1_50, %c0_51] : memref<32x128xbf16, #tpu.memory_space<vmem>>, vector<24x128xbf16>
    %c128 = arith.constant 128 : index
    %c0_52 = arith.constant 0 : index
    %90 = vector.load %arg3[%c128, %c0_52] : memref<1152x128xbf16, #tpu.memory_space<vmem>>, vector<128x128xbf16>
    %cst_53 = arith.constant dense<0.000000e+00> : vector<24x128xf32>
    %91 = tpu.matmul %89, %90, %cst_53 {dimension_numbers = #tpu.dot_dimension_numbers<[1], [0], [0], [1], [0, 0, 1, 1], [], []>} : vector<24x128xbf16>, vector<128x128xbf16>, vector<24x128xf32> -> vector<24x128xf32>
    %92 = arith.addf %88, %91 : vector<24x128xf32>
    %c2 = arith.constant 2 : index
    %c0_54 = arith.constant 0 : index
    %93 = vector.load %arg11[%c2, %c0_54] : memref<32x128xbf16, #tpu.memory_space<vmem>>, vector<24x128xbf16>
    %c256 = arith.constant 256 : index
    %c0_55 = arith.constant 0 : index
    %94 = vector.load %arg3[%c256, %c0_55] : memref<1152x128xbf16, #tpu.memory_space<vmem>>, vector<128x128xbf16>
    %cst_56 = arith.constant dense<0.000000e+00> : vector<24x128xf32>
    %95 = tpu.matmul %93, %94, %cst_56 {dimension_numbers = #tpu.dot_dimension_numbers<[1], [0], [0], [1], [0, 0, 1, 1], [], []>} : vector<24x128xbf16>, vector<128x128xbf16>, vector<24x128xf32> -> vector<24x128xf32>
    %96 = arith.addf %92, %95 : vector<24x128xf32>
    %c3_57 = arith.constant 3 : index
    %c0_58 = arith.constant 0 : index
    %97 = vector.load %arg11[%c3_57, %c0_58] : memref<32x128xbf16, #tpu.memory_space<vmem>>, vector<24x128xbf16>
    %c384 = arith.constant 384 : index
    %c0_59 = arith.constant 0 : index
    %98 = vector.load %arg3[%c384, %c0_59] : memref<1152x128xbf16, #tpu.memory_space<vmem>>, vector<128x128xbf16>
    %cst_60 = arith.constant dense<0.000000e+00> : vector<24x128xf32>
    %99 = tpu.matmul %97, %98, %cst_60 {dimension_numbers = #tpu.dot_dimension_numbers<[1], [0], [0], [1], [0, 0, 1, 1], [], []>} : vector<24x128xbf16>, vector<128x128xbf16>, vector<24x128xf32> -> vector<24x128xf32>
    %100 = arith.addf %96, %99 : vector<24x128xf32>
    %c4_61 = arith.constant 4 : index
    %c0_62 = arith.constant 0 : index
    %101 = vector.load %arg11[%c4_61, %c0_62] : memref<32x128xbf16, #tpu.memory_space<vmem>>, vector<24x128xbf16>
    %c512 = arith.constant 512 : index
    %c0_63 = arith.constant 0 : index
    %102 = vector.load %arg3[%c512, %c0_63] : memref<1152x128xbf16, #tpu.memory_space<vmem>>, vector<128x128xbf16>
    %cst_64 = arith.constant dense<0.000000e+00> : vector<24x128xf32>
    %103 = tpu.matmul %101, %102, %cst_64 {dimension_numbers = #tpu.dot_dimension_numbers<[1], [0], [0], [1], [0, 0, 1, 1], [], []>} : vector<24x128xbf16>, vector<128x128xbf16>, vector<24x128xf32> -> vector<24x128xf32>
    %104 = arith.addf %100, %103 : vector<24x128xf32>
    %c5 = arith.constant 5 : index
    %c0_65 = arith.constant 0 : index
    %105 = vector.load %arg11[%c5, %c0_65] : memref<32x128xbf16, #tpu.memory_space<vmem>>, vector<24x128xbf16>
    %c640 = arith.constant 640 : index
    %c0_66 = arith.constant 0 : index
    %106 = vector.load %arg3[%c640, %c0_66] : memref<1152x128xbf16, #tpu.memory_space<vmem>>, vector<128x128xbf16>
    %cst_67 = arith.constant dense<0.000000e+00> : vector<24x128xf32>
    %107 = tpu.matmul %105, %106, %cst_67 {dimension_numbers = #tpu.dot_dimension_numbers<[1], [0], [0], [1], [0, 0, 1, 1], [], []>} : vector<24x128xbf16>, vector<128x128xbf16>, vector<24x128xf32> -> vector<24x128xf32>
    %108 = arith.addf %104, %107 : vector<24x128xf32>
    %c6 = arith.constant 6 : index
    %c0_68 = arith.constant 0 : index
    %109 = vector.load %arg11[%c6, %c0_68] : memref<32x128xbf16, #tpu.memory_space<vmem>>, vector<24x128xbf16>
    %c768 = arith.constant 768 : index
    %c0_69 = arith.constant 0 : index
    %110 = vector.load %arg3[%c768, %c0_69] : memref<1152x128xbf16, #tpu.memory_space<vmem>>, vector<128x128xbf16>
    %cst_70 = arith.constant dense<0.000000e+00> : vector<24x128xf32>
    %111 = tpu.matmul %109, %110, %cst_70 {dimension_numbers = #tpu.dot_dimension_numbers<[1], [0], [0], [1], [0, 0, 1, 1], [], []>} : vector<24x128xbf16>, vector<128x128xbf16>, vector<24x128xf32> -> vector<24x128xf32>
    %112 = arith.addf %108, %111 : vector<24x128xf32>
    %c7 = arith.constant 7 : index
    %c0_71 = arith.constant 0 : index
    %113 = vector.load %arg11[%c7, %c0_71] : memref<32x128xbf16, #tpu.memory_space<vmem>>, vector<24x128xbf16>
    %c896 = arith.constant 896 : index
    %c0_72 = arith.constant 0 : index
    %114 = vector.load %arg3[%c896, %c0_72] : memref<1152x128xbf16, #tpu.memory_space<vmem>>, vector<128x128xbf16>
    %cst_73 = arith.constant dense<0.000000e+00> : vector<24x128xf32>
    %115 = tpu.matmul %113, %114, %cst_73 {dimension_numbers = #tpu.dot_dimension_numbers<[1], [0], [0], [1], [0, 0, 1, 1], [], []>} : vector<24x128xbf16>, vector<128x128xbf16>, vector<24x128xf32> -> vector<24x128xf32>
    %116 = arith.addf %112, %115 : vector<24x128xf32>
    %c8 = arith.constant 8 : index
    %c0_74 = arith.constant 0 : index
    %117 = vector.load %arg11[%c8, %c0_74] : memref<32x128xbf16, #tpu.memory_space<vmem>>, vector<24x128xbf16>
    %c1024 = arith.constant 1024 : index
    %c0_75 = arith.constant 0 : index
    %118 = vector.load %arg3[%c1024, %c0_75] : memref<1152x128xbf16, #tpu.memory_space<vmem>>, vector<128x128xbf16>
    %cst_76 = arith.constant dense<0.000000e+00> : vector<24x128xf32>
    %119 = tpu.matmul %117, %118, %cst_76 {dimension_numbers = #tpu.dot_dimension_numbers<[1], [0], [0], [1], [0, 0, 1, 1], [], []>} : vector<24x128xbf16>, vector<128x128xbf16>, vector<24x128xf32> -> vector<24x128xf32>
    %120 = arith.addf %116, %119 : vector<24x128xf32>
    %c0_77 = arith.constant 0 : index
    %c0_78 = arith.constant 0 : index
    %121 = vector.load %arg7[%c0_77, %c0_78] : memref<1x128xf32, #tpu.memory_space<vmem>>, vector<1x128xf32>
    %122 = vector.broadcast %121 : vector<1x128xf32> to vector<24x128xf32>
    %123 = arith.addf %120, %122 : vector<24x128xf32>
    %cst_79 = arith.constant 0.000000e+00 : f32
    %124 = vector.broadcast %cst_79 : f32 to vector<24x128xf32>
    %125 = arith.cmpf oge, %123, %124 : vector<24x128xf32>
    %cst_80 = arith.constant 2.000000e-01 : f32
    %126 = vector.broadcast %cst_80 : f32 to vector<24x128xf32>
    %127 = arith.mulf %126, %123 : vector<24x128xf32>
    %128 = arith.select %125, %123, %127 : vector<24x128xi1>, vector<24x128xf32>
    %cst_81 = arith.constant 0.000000e+00 : f32
    %129 = vector.broadcast %cst_81 : f32 to vector<24x128xf32>
    %130 = arith.select %26, %128, %129 : vector<24x128xi1>, vector<24x128xf32>
    %131 = arith.truncf %130 : vector<24x128xf32> to vector<24x128xbf16>
    %c4_82 = arith.constant 4 : index
    %c0_83 = arith.constant 0 : index
    %132 = vector.load %arg11[%c4_82, %c0_83] : memref<32x128xbf16, #tpu.memory_space<vmem>>, vector<24x128xbf16>
    tpu.vector_store %arg11[%c4_82, %c0_83], %131 {strides = array<i32>} : memref<32x128xbf16, #tpu.memory_space<vmem>>, vector<24x128xbf16>,
    %cst_84 = arith.constant 0.000000e+00 : f32
    %133 = vector.broadcast %cst_84 : f32 to vector<24x128xf32>
    %c0_85 = arith.constant 0 : index
    %c0_86 = arith.constant 0 : index
    %134 = vector.load %arg11[%c0_85, %c0_86] : memref<32x128xbf16, #tpu.memory_space<vmem>>, vector<24x128xbf16>
    %c0_87 = arith.constant 0 : index
    %c0_88 = arith.constant 0 : index
    %135 = vector.load %arg4[%c0_87, %c0_88] : memref<1152x128xbf16, #tpu.memory_space<vmem>>, vector<128x128xbf16>
    %cst_89 = arith.constant dense<0.000000e+00> : vector<24x128xf32>
    %136 = tpu.matmul %134, %135, %cst_89 {dimension_numbers = #tpu.dot_dimension_numbers<[1], [0], [0], [1], [0, 0, 1, 1], [], []>} : vector<24x128xbf16>, vector<128x128xbf16>, vector<24x128xf32> -> vector<24x128xf32>
    %137 = arith.addf %133, %136 : vector<24x128xf32>
    %c1_90 = arith.constant 1 : index
    %c0_91 = arith.constant 0 : index
    %138 = vector.load %arg11[%c1_90, %c0_91] : memref<32x128xbf16, #tpu.memory_space<vmem>>, vector<24x128xbf16>
    %c128_92 = arith.constant 128 : index
    %c0_93 = arith.constant 0 : index
    %139 = vector.load %arg4[%c128_92, %c0_93] : memref<1152x128xbf16, #tpu.memory_space<vmem>>, vector<128x128xbf16>
    %cst_94 = arith.constant dense<0.000000e+00> : vector<24x128xf32>
    %140 = tpu.matmul %138, %139, %cst_94 {dimension_numbers = #tpu.dot_dimension_numbers<[1], [0], [0], [1], [0, 0, 1, 1], [], []>} : vector<24x128xbf16>, vector<128x128xbf16>, vector<24x128xf32> -> vector<24x128xf32>
    %141 = arith.addf %137, %140 : vector<24x128xf32>
    %c2_95 = arith.constant 2 : index
    %c0_96 = arith.constant 0 : index
    %142 = vector.load %arg11[%c2_95, %c0_96] : memref<32x128xbf16, #tpu.memory_space<vmem>>, vector<24x128xbf16>
    %c256_97 = arith.constant 256 : index
    %c0_98 = arith.constant 0 : index
    %143 = vector.load %arg4[%c256_97, %c0_98] : memref<1152x128xbf16, #tpu.memory_space<vmem>>, vector<128x128xbf16>
    %cst_99 = arith.constant dense<0.000000e+00> : vector<24x128xf32>
    %144 = tpu.matmul %142, %143, %cst_99 {dimension_numbers = #tpu.dot_dimension_numbers<[1], [0], [0], [1], [0, 0, 1, 1], [], []>} : vector<24x128xbf16>, vector<128x128xbf16>, vector<24x128xf32> -> vector<24x128xf32>
    %145 = arith.addf %141, %144 : vector<24x128xf32>
    %c3_100 = arith.constant 3 : index
    %c0_101 = arith.constant 0 : index
    %146 = vector.load %arg11[%c3_100, %c0_101] : memref<32x128xbf16, #tpu.memory_space<vmem>>, vector<24x128xbf16>
    %c384_102 = arith.constant 384 : index
    %c0_103 = arith.constant 0 : index
    %147 = vector.load %arg4[%c384_102, %c0_103] : memref<1152x128xbf16, #tpu.memory_space<vmem>>, vector<128x128xbf16>
    %cst_104 = arith.constant dense<0.000000e+00> : vector<24x128xf32>
    %148 = tpu.matmul %146, %147, %cst_104 {dimension_numbers = #tpu.dot_dimension_numbers<[1], [0], [0], [1], [0, 0, 1, 1], [], []>} : vector<24x128xbf16>, vector<128x128xbf16>, vector<24x128xf32> -> vector<24x128xf32>
    %149 = arith.addf %145, %148 : vector<24x128xf32>
    %c4_105 = arith.constant 4 : index
    %c0_106 = arith.constant 0 : index
    %150 = vector.load %arg11[%c4_105, %c0_106] : memref<32x128xbf16, #tpu.memory_space<vmem>>, vector<24x128xbf16>
    %c512_107 = arith.constant 512 : index
    %c0_108 = arith.constant 0 : index
    %151 = vector.load %arg4[%c512_107, %c0_108] : memref<1152x128xbf16, #tpu.memory_space<vmem>>, vector<128x128xbf16>
    %cst_109 = arith.constant dense<0.000000e+00> : vector<24x128xf32>
    %152 = tpu.matmul %150, %151, %cst_109 {dimension_numbers = #tpu.dot_dimension_numbers<[1], [0], [0], [1], [0, 0, 1, 1], [], []>} : vector<24x128xbf16>, vector<128x128xbf16>, vector<24x128xf32> -> vector<24x128xf32>
    %153 = arith.addf %149, %152 : vector<24x128xf32>
    %c5_110 = arith.constant 5 : index
    %c0_111 = arith.constant 0 : index
    %154 = vector.load %arg11[%c5_110, %c0_111] : memref<32x128xbf16, #tpu.memory_space<vmem>>, vector<24x128xbf16>
    %c640_112 = arith.constant 640 : index
    %c0_113 = arith.constant 0 : index
    %155 = vector.load %arg4[%c640_112, %c0_113] : memref<1152x128xbf16, #tpu.memory_space<vmem>>, vector<128x128xbf16>
    %cst_114 = arith.constant dense<0.000000e+00> : vector<24x128xf32>
    %156 = tpu.matmul %154, %155, %cst_114 {dimension_numbers = #tpu.dot_dimension_numbers<[1], [0], [0], [1], [0, 0, 1, 1], [], []>} : vector<24x128xbf16>, vector<128x128xbf16>, vector<24x128xf32> -> vector<24x128xf32>
    %157 = arith.addf %153, %156 : vector<24x128xf32>
    %c6_115 = arith.constant 6 : index
    %c0_116 = arith.constant 0 : index
    %158 = vector.load %arg11[%c6_115, %c0_116] : memref<32x128xbf16, #tpu.memory_space<vmem>>, vector<24x128xbf16>
    %c768_117 = arith.constant 768 : index
    %c0_118 = arith.constant 0 : index
    %159 = vector.load %arg4[%c768_117, %c0_118] : memref<1152x128xbf16, #tpu.memory_space<vmem>>, vector<128x128xbf16>
    %cst_119 = arith.constant dense<0.000000e+00> : vector<24x128xf32>
    %160 = tpu.matmul %158, %159, %cst_119 {dimension_numbers = #tpu.dot_dimension_numbers<[1], [0], [0], [1], [0, 0, 1, 1], [], []>} : vector<24x128xbf16>, vector<128x128xbf16>, vector<24x128xf32> -> vector<24x128xf32>
    %161 = arith.addf %157, %160 : vector<24x128xf32>
    %c7_120 = arith.constant 7 : index
    %c0_121 = arith.constant 0 : index
    %162 = vector.load %arg11[%c7_120, %c0_121] : memref<32x128xbf16, #tpu.memory_space<vmem>>, vector<24x128xbf16>
    %c896_122 = arith.constant 896 : index
    %c0_123 = arith.constant 0 : index
    %163 = vector.load %arg4[%c896_122, %c0_123] : memref<1152x128xbf16, #tpu.memory_space<vmem>>, vector<128x128xbf16>
    %cst_124 = arith.constant dense<0.000000e+00> : vector<24x128xf32>
    %164 = tpu.matmul %162, %163, %cst_124 {dimension_numbers = #tpu.dot_dimension_numbers<[1], [0], [0], [1], [0, 0, 1, 1], [], []>} : vector<24x128xbf16>, vector<128x128xbf16>, vector<24x128xf32> -> vector<24x128xf32>
    %165 = arith.addf %161, %164 : vector<24x128xf32>
    %c8_125 = arith.constant 8 : index
    %c0_126 = arith.constant 0 : index
    %166 = vector.load %arg11[%c8_125, %c0_126] : memref<32x128xbf16, #tpu.memory_space<vmem>>, vector<24x128xbf16>
    %c1024_127 = arith.constant 1024 : index
    %c0_128 = arith.constant 0 : index
    %167 = vector.load %arg4[%c1024_127, %c0_128] : memref<1152x128xbf16, #tpu.memory_space<vmem>>, vector<128x128xbf16>
    %cst_129 = arith.constant dense<0.000000e+00> : vector<24x128xf32>
    %168 = tpu.matmul %166, %167, %cst_129 {dimension_numbers = #tpu.dot_dimension_numbers<[1], [0], [0], [1], [0, 0, 1, 1], [], []>} : vector<24x128xbf16>, vector<128x128xbf16>, vector<24x128xf32> -> vector<24x128xf32>
    %169 = arith.addf %165, %168 : vector<24x128xf32>
    %c0_130 = arith.constant 0 : index
    %c0_131 = arith.constant 0 : index
    %170 = vector.load %arg8[%c0_130, %c0_131] : memref<1x128xf32, #tpu.memory_space<vmem>>, vector<1x128xf32>
    %171 = vector.broadcast %170 : vector<1x128xf32> to vector<24x128xf32>
    %172 = arith.addf %169, %171 : vector<24x128xf32>
    %cst_132 = arith.constant 0.000000e+00 : f32
    %173 = vector.broadcast %cst_132 : f32 to vector<24x128xf32>
    %174 = arith.cmpf oge, %172, %173 : vector<24x128xf32>
    %cst_133 = arith.constant 2.000000e-01 : f32
    %175 = vector.broadcast %cst_133 : f32 to vector<24x128xf32>
    %176 = arith.mulf %175, %172 : vector<24x128xf32>
    %177 = arith.select %174, %172, %176 : vector<24x128xi1>, vector<24x128xf32>
    %cst_134 = arith.constant 0.000000e+00 : f32
    %178 = vector.broadcast %cst_134 : f32 to vector<24x128xf32>
    %179 = arith.select %26, %177, %178 : vector<24x128xi1>, vector<24x128xf32>
    %180 = arith.truncf %179 : vector<24x128xf32> to vector<24x128xbf16>
    %c4_135 = arith.constant 4 : index
    %c0_136 = arith.constant 0 : index
    %181 = vector.load %arg11[%c4_135, %c0_136] : memref<32x128xbf16, #tpu.memory_space<vmem>>, vector<24x128xbf16>
    tpu.vector_store %arg11[%c4_135, %c0_136], %180 {strides = array<i32>} : memref<32x128xbf16, #tpu.memory_space<vmem>>, vector<24x128xbf16>,
    %cst_137 = arith.constant 0.000000e+00 : f32
    %182 = vector.broadcast %cst_137 : f32 to vector<24x128xf32>
    %c0_138 = arith.constant 0 : index
    %c0_139 = arith.constant 0 : index
    %183 = vector.load %arg11[%c0_138, %c0_139] : memref<32x128xbf16, #tpu.memory_space<vmem>>, vector<24x128xbf16>
    %c0_140 = arith.constant 0 : index
    %c0_141 = arith.constant 0 : index
    %184 = vector.load %arg5[%c0_140, %c0_141] : memref<1152x128xbf16, #tpu.memory_space<vmem>>, vector<128x128xbf16>
    %cst_142 = arith.constant dense<0.000000e+00> : vector<24x128xf32>
    %185 = tpu.matmul %183, %184, %cst_142 {dimension_numbers = #tpu.dot_dimension_numbers<[1], [0], [0], [1], [0, 0, 1, 1], [], []>} : vector<24x128xbf16>, vector<128x128xbf16>, vector<24x128xf32> -> vector<24x128xf32>
    %186 = arith.addf %182, %185 : vector<24x128xf32>
    %c1_143 = arith.constant 1 : index
    %c0_144 = arith.constant 0 : index
    %187 = vector.load %arg11[%c1_143, %c0_144] : memref<32x128xbf16, #tpu.memory_space<vmem>>, vector<24x128xbf16>
    %c128_145 = arith.constant 128 : index
    %c0_146 = arith.constant 0 : index
    %188 = vector.load %arg5[%c128_145, %c0_146] : memref<1152x128xbf16, #tpu.memory_space<vmem>>, vector<128x128xbf16>
    %cst_147 = arith.constant dense<0.000000e+00> : vector<24x128xf32>
    %189 = tpu.matmul %187, %188, %cst_147 {dimension_numbers = #tpu.dot_dimension_numbers<[1], [0], [0], [1], [0, 0, 1, 1], [], []>} : vector<24x128xbf16>, vector<128x128xbf16>, vector<24x128xf32> -> vector<24x128xf32>
    %190 = arith.addf %186, %189 : vector<24x128xf32>
    %c2_148 = arith.constant 2 : index
    %c0_149 = arith.constant 0 : index
    %191 = vector.load %arg11[%c2_148, %c0_149] : memref<32x128xbf16, #tpu.memory_space<vmem>>, vector<24x128xbf16>
    %c256_150 = arith.constant 256 : index
    %c0_151 = arith.constant 0 : index
    %192 = vector.load %arg5[%c256_150, %c0_151] : memref<1152x128xbf16, #tpu.memory_space<vmem>>, vector<128x128xbf16>
    %cst_152 = arith.constant dense<0.000000e+00> : vector<24x128xf32>
    %193 = tpu.matmul %191, %192, %cst_152 {dimension_numbers = #tpu.dot_dimension_numbers<[1], [0], [0], [1], [0, 0, 1, 1], [], []>} : vector<24x128xbf16>, vector<128x128xbf16>, vector<24x128xf32> -> vector<24x128xf32>
    %194 = arith.addf %190, %193 : vector<24x128xf32>
    %c3_153 = arith.constant 3 : index
    %c0_154 = arith.constant 0 : index
    %195 = vector.load %arg11[%c3_153, %c0_154] : memref<32x128xbf16, #tpu.memory_space<vmem>>, vector<24x128xbf16>
    %c384_155 = arith.constant 384 : index
    %c0_156 = arith.constant 0 : index
    %196 = vector.load %arg5[%c384_155, %c0_156] : memref<1152x128xbf16, #tpu.memory_space<vmem>>, vector<128x128xbf16>
    %cst_157 = arith.constant dense<0.000000e+00> : vector<24x128xf32>
    %197 = tpu.matmul %195, %196, %cst_157 {dimension_numbers = #tpu.dot_dimension_numbers<[1], [0], [0], [1], [0, 0, 1, 1], [], []>} : vector<24x128xbf16>, vector<128x128xbf16>, vector<24x128xf32> -> vector<24x128xf32>
    %198 = arith.addf %194, %197 : vector<24x128xf32>
    %c4_158 = arith.constant 4 : index
    %c0_159 = arith.constant 0 : index
    %199 = vector.load %arg11[%c4_158, %c0_159] : memref<32x128xbf16, #tpu.memory_space<vmem>>, vector<24x128xbf16>
    %c512_160 = arith.constant 512 : index
    %c0_161 = arith.constant 0 : index
    %200 = vector.load %arg5[%c512_160, %c0_161] : memref<1152x128xbf16, #tpu.memory_space<vmem>>, vector<128x128xbf16>
    %cst_162 = arith.constant dense<0.000000e+00> : vector<24x128xf32>
    %201 = tpu.matmul %199, %200, %cst_162 {dimension_numbers = #tpu.dot_dimension_numbers<[1], [0], [0], [1], [0, 0, 1, 1], [], []>} : vector<24x128xbf16>, vector<128x128xbf16>, vector<24x128xf32> -> vector<24x128xf32>
    %202 = arith.addf %198, %201 : vector<24x128xf32>
    %c5_163 = arith.constant 5 : index
    %c0_164 = arith.constant 0 : index
    %203 = vector.load %arg11[%c5_163, %c0_164] : memref<32x128xbf16, #tpu.memory_space<vmem>>, vector<24x128xbf16>
    %c640_165 = arith.constant 640 : index
    %c0_166 = arith.constant 0 : index
    %204 = vector.load %arg5[%c640_165, %c0_166] : memref<1152x128xbf16, #tpu.memory_space<vmem>>, vector<128x128xbf16>
    %cst_167 = arith.constant dense<0.000000e+00> : vector<24x128xf32>
    %205 = tpu.matmul %203, %204, %cst_167 {dimension_numbers = #tpu.dot_dimension_numbers<[1], [0], [0], [1], [0, 0, 1, 1], [], []>} : vector<24x128xbf16>, vector<128x128xbf16>, vector<24x128xf32> -> vector<24x128xf32>
    %206 = arith.addf %202, %205 : vector<24x128xf32>
    %c6_168 = arith.constant 6 : index
    %c0_169 = arith.constant 0 : index
    %207 = vector.load %arg11[%c6_168, %c0_169] : memref<32x128xbf16, #tpu.memory_space<vmem>>, vector<24x128xbf16>
    %c768_170 = arith.constant 768 : index
    %c0_171 = arith.constant 0 : index
    %208 = vector.load %arg5[%c768_170, %c0_171] : memref<1152x128xbf16, #tpu.memory_space<vmem>>, vector<128x128xbf16>
    %cst_172 = arith.constant dense<0.000000e+00> : vector<24x128xf32>
    %209 = tpu.matmul %207, %208, %cst_172 {dimension_numbers = #tpu.dot_dimension_numbers<[1], [0], [0], [1], [0, 0, 1, 1], [], []>} : vector<24x128xbf16>, vector<128x128xbf16>, vector<24x128xf32> -> vector<24x128xf32>
    %210 = arith.addf %206, %209 : vector<24x128xf32>
    %c7_173 = arith.constant 7 : index
    %c0_174 = arith.constant 0 : index
    %211 = vector.load %arg11[%c7_173, %c0_174] : memref<32x128xbf16, #tpu.memory_space<vmem>>, vector<24x128xbf16>
    %c896_175 = arith.constant 896 : index
    %c0_176 = arith.constant 0 : index
    %212 = vector.load %arg5[%c896_175, %c0_176] : memref<1152x128xbf16, #tpu.memory_space<vmem>>, vector<128x128xbf16>
    %cst_177 = arith.constant dense<0.000000e+00> : vector<24x128xf32>
    %213 = tpu.matmul %211, %212, %cst_177 {dimension_numbers = #tpu.dot_dimension_numbers<[1], [0], [0], [1], [0, 0, 1, 1], [], []>} : vector<24x128xbf16>, vector<128x128xbf16>, vector<24x128xf32> -> vector<24x128xf32>
    %214 = arith.addf %210, %213 : vector<24x128xf32>
    %c8_178 = arith.constant 8 : index
    %c0_179 = arith.constant 0 : index
    %215 = vector.load %arg11[%c8_178, %c0_179] : memref<32x128xbf16, #tpu.memory_space<vmem>>, vector<24x128xbf16>
    %c1024_180 = arith.constant 1024 : index
    %c0_181 = arith.constant 0 : index
    %216 = vector.load %arg5[%c1024_180, %c0_181] : memref<1152x128xbf16, #tpu.memory_space<vmem>>, vector<128x128xbf16>
    %cst_182 = arith.constant dense<0.000000e+00> : vector<24x128xf32>
    %217 = tpu.matmul %215, %216, %cst_182 {dimension_numbers = #tpu.dot_dimension_numbers<[1], [0], [0], [1], [0, 0, 1, 1], [], []>} : vector<24x128xbf16>, vector<128x128xbf16>, vector<24x128xf32> -> vector<24x128xf32>
    %218 = arith.addf %214, %217 : vector<24x128xf32>
    %c0_183 = arith.constant 0 : index
    %c0_184 = arith.constant 0 : index
    %219 = vector.load %arg9[%c0_183, %c0_184] : memref<1x128xf32, #tpu.memory_space<vmem>>, vector<1x128xf32>
    %220 = vector.broadcast %219 : vector<1x128xf32> to vector<24x128xf32>
    %221 = arith.addf %218, %220 : vector<24x128xf32>
    %222 = arith.truncf %221 : vector<24x128xf32> to vector<24x128xbf16>
    %c0_185 = arith.constant 0 : index
    %c0_186 = arith.constant 0 : index
    %c0_187 = arith.constant 0 : index
    %223 = vector.load %arg10[%c0_185, %c0_186, %c0_187] : memref<1x24x128xbf16, #tpu.memory_space<vmem>>, vector<1x24x128xbf16>
    %224 = vector.shape_cast %223 : vector<1x24x128xbf16> to vector<24x128xbf16>
    %225 = vector.shape_cast %222 : vector<24x128xbf16> to vector<1x24x128xbf16>
    tpu.vector_store %arg10[%c0_185, %c0_186, %c0_187], %225 {strides = array<i32>} : memref<1x24x128xbf16, #tpu.memory_space<vmem>>, vector<1x24x128xbf16>,
    return
  }
  func.func @transform_0(%arg0: i32) -> (i32, i32, i32) {
    %c0_i32 = arith.constant 0 : i32
    %c0_i32_0 = arith.constant 0 : i32
    %c0_i32_1 = arith.constant 0 : i32
    return %arg0, %c0_i32, %c0_i32_0 : i32, i32, i32
  }
  func.func @transform_1(%arg0: i32) -> (i32, i32) {
    %c0_i32 = arith.constant 0 : i32
    %c0_i32_0 = arith.constant 0 : i32
    %c0_i32_1 = arith.constant 0 : i32
    return %c0_i32, %c0_i32_0 : i32, i32
  }
  func.func @transform_2(%arg0: i32) -> (i32, i32) {
    %c0_i32 = arith.constant 0 : i32
    %c0_i32_0 = arith.constant 0 : i32
    %c0_i32_1 = arith.constant 0 : i32
    return %c0_i32, %c0_i32_0 : i32, i32
  }
  func.func @transform_3(%arg0: i32) -> (i32, i32) {
    %c0_i32 = arith.constant 0 : i32
    %c0_i32_0 = arith.constant 0 : i32
    %c0_i32_1 = arith.constant 0 : i32
    return %c0_i32, %c0_i32_0 : i32, i32
  }
  func.func @transform_4(%arg0: i32) -> (i32, i32) {
    %c0_i32 = arith.constant 0 : i32
    %c0_i32_0 = arith.constant 0 : i32
    %c0_i32_1 = arith.constant 0 : i32
    return %c0_i32, %c0_i32_0 : i32, i32
  }
  func.func @transform_5(%arg0: i32) -> (i32, i32) {
    %c0_i32 = arith.constant 0 : i32
    %c0_i32_0 = arith.constant 0 : i32
    %c0_i32_1 = arith.constant 0 : i32
    return %c0_i32, %c0_i32_0 : i32, i32
  }
  func.func @transform_6(%arg0: i32) -> (i32, i32) {
    %c0_i32 = arith.constant 0 : i32
    %c0_i32_0 = arith.constant 0 : i32
    %c0_i32_1 = arith.constant 0 : i32
    return %c0_i32, %c0_i32_0 : i32, i32
  }
  func.func @transform_7(%arg0: i32) -> (i32, i32) {
    %c0_i32 = arith.constant 0 : i32
    %c0_i32_0 = arith.constant 0 : i32
    %c0_i32_1 = arith.constant 0 : i32
    return %c0_i32, %c0_i32_0 : i32, i32
  }
  func.func @transform_8(%arg0: i32) -> (i32, i32) {
    %c0_i32 = arith.constant 0 : i32
    %c0_i32_0 = arith.constant 0 : i32
    %c0_i32_1 = arith.constant 0 : i32
    return %c0_i32, %c0_i32_0 : i32, i32
  }
  func.func @transform_9(%arg0: i32) -> (i32, i32, i32) {
    %c0_i32 = arith.constant 0 : i32
    %c0_i32_0 = arith.constant 0 : i32
    %c0_i32_1 = arith.constant 0 : i32
    return %arg0, %c0_i32, %c0_i32_0 : i32, i32, i32
  }
}

</mosaic_0001>

<bundles_post_ra>
// kernel: head_forward.1
= control target key start
LH: loop header
LB: loop body
LE: loop exit
PB: predicated region body
PF: predicated region fallthrough
CT: control target
= control target key end

     0   :  { %14 = vsyncpa [#allocation4], 0  ;;  %s6129_s30 = smov 0   ;;  %s6910_s0 = inlined_call_operand.vmem [shape: bf16[2,28,48], index: 0, kind: input, shape index: {}]   ;;  %s6911_s1 = inlined_call_operand.vmem [shape: bf16[192,128], index: 1, kind: input, shape index: {}]   ;;  %s6912_s2 = inlined_call_operand.vmem [shape: bf16[1152,128], index: 2, kind: input, shape index: {}]   ;;  %s6913_s3 = inlined_call_operand.vmem [shape: bf16[1152,128], index: 3, kind: input, shape index: {}]   ;;  %s6914_s4 = inlined_call_operand.hbm [shape: bf16[1152,128], index: 4, kind: input, shape index: {}]   ;;  %s6915_s5 = inlined_call_operand.vmem [shape: f32[1,128], index: 5, kind: input, shape index: {}]   ;;  %s6916_s6 = inlined_call_operand.vmem [shape: f32[1,128], index: 6, kind: input, shape index: {}]   ;;  %s6917_s7 = inlined_call_operand.vmem [shape: f32[1,128], index: 7, kind: input, shape index: {}]   ;;  %s6918_s8 = inlined_call_operand.vmem [shape: f32[1,128], index: 8, kind: input, shape index: {}]   ;;  %s6919_s9 = inlined_call_operand.vmem [shape: bf16[2,24,128], index: 9, kind: output, shape index: {}]  }
   0x1 LB: > { %s6135_s10 = sadd.s32 4294967295, %s6072_s30   ;;  %p4556_p0 = scmp.ge.s32.totalorder %s6072_s30, 1  ;;  %s6072_s30 = sphi %s6129_s30, %s20_s30  }
   0x2   : > { %p245_p1 = scmp.lt.s32.totalorder %s6072_s30, 3  ;;  %s6074_s11 = smov [#allocation3]  }
   0x3   : > { %s266_s12 = sshll.u32 %s6074_s11, 4  ;;  %p5757_p3 = scmp.eq.s32.totalorder %s6135_s10, 0  ;;  %s267_s12 = int_to_ptr.vmem [resolvable:$true] %s266_s12 }
   0x4   : > { %p6139_p2 = pnand %p4556_p0, %p245_p1  ;;  %s6047_s14 = scalar_lea.vmem %s267_s12, 9216 }
   0x5   : > { %p6048_p7 = scmp.ne.s32.totalorder %s267_s12, %s6047_s14  ;;  %p6055_p10 = scmp.lt.s32.totalorder %s267_s12, %s267_s12 }
   0x6   : > { %p5753_p4 = pneg %p6139_p2  ;;  %p6056_p11 = scmp.lt.s32.totalorder %s6047_s14, %s6047_s14 }
   0x8   : > { %p5754_p5 = pnand %p5757_p3, %p5753_p4  ;;  %p6057_p12 = por %p6056_p11, %p6055_p10 }
   0xa   : > { %p6038_p6 = pneg %p5754_p5 }
   0xc   : > { %p6050_p8 = pnand %p6048_p7, %p6038_p6 }
   0xe   : > { %p6051_p9 = pneg %p6050_p8 }
  0x10   : > { %p6058_p13 = pnand %p6057_p12, %p6051_p9 }
  0x12   : > { %6061 = shalt.err (!%p6058_p13)
}
  0x13   : > { %s6075_s15 = smov 64   ;;  %s6076_s16 = smov 4  }
  0x14   : > { %5756 = dma.hbm_to_vmem [thread:$0]  (!%p5754_p5), %s6914_s4, 9216, %s267_s12, [#allocation4], %s6075_s15, %s6075_s15, %s6076_s16  }
  0x15   : > { %302 = sbr.rel (%p6139_p2) target bundleno = 1354 (0x54a), region = 56 }
  0x1a   : > { %6067 = dma.done.wait (%p5757_p3), [#allocation4], 9216  }
  0x1b   : > { %6069 = vsyncadd (%p5757_p3), [#allocation4], 4294958080  ;;  %p338_p0 = scmp.lt.s32.totalorder %s6135_s10, 1  ;;  %v6077_v0 = vmov 0   ;;  %v5772_v1 = vld [vmem:[%s6911_s1 + $0x28] sm:$0xff]   ;;  %v5773_v2 = vld [vmem:[%s6911_s1 + $0x20] sm:$0xff]  }
  0x1c   : > { %350 = vst [vmem:[#allocation2] sm:$0x3] %v6077_v0  ;;  %351 = vst [vmem:[#allocation2 + $0xc] sm:$0xc] %v6077_v0  ;;  %5168 = vmatprep.subr.bf16.mxu1 %v5772_v1  ;;  %v5774_v3 = vld [vmem:[%s6911_s1 + $0x18] sm:$0xff]   ;;  %v5776_v16 = vld [vmem:[%s6911_s1 + $0x40] sm:$0xff]  }
  0x1d   : > { %s6930_s10 = smov (!%p338_p0, %s6135_s10), 1  ;;  %5169 = vmatpush3.bf16.msra.mxu1 %v5772_v1  ;;  %v6078_v12 = vmov 1065369472   ;;  %v5775_v18 = vld [vmem:[%s6911_s1 + $0x10] sm:$0xff]   ;;  %5188 = vmatprep.subr.bf16.mxu0 %v5776_v16  ;;  %v5778_v20 = vld [vmem:[%s6911_s1 + $0x38] sm:$0xff]   ;;  %vm462_vm1 = vcmask 392192  }
  0x1e   : > { %s4860_s19 = sshll.u32 %s6930_s10, 4  ;;  %5170 = vmatprep.subr.bf16.mxu1 %v5773_v2  ;;  %vm428_vm0 = vsmask.f32 7424  ;;  %5189 = vmatpush3.bf16.msra.mxu0 %v5776_v16  ;;  %v5780_v24 = vld [vmem:[%s6911_s1 + $0x30] sm:$0xff]   ;;  %v5777_v34 = vld [vmem:[%s6911_s1 + $0x8] sm:$0xff]   ;;  %v5779_v46 = vld [vmem:[%s6911_s1] sm:$0xff]  }
  0x1f   : > { %s6168_s24 = scalar_lea.vmem %s6910_s0, %s4860_s19  ;;  %5190 = vmatprep.subr.bf16.mxu0 %v5778_v20  ;;  %vm607_vm2 = vsmask.f32 6400  ;;  %vm712_vm3 = vcmask 1045504   ;;  %v5781_v56 = vld [vmem:[%s6911_s1 + $0x58] sm:$0xff]   ;;  %v5782_v61 = vld [vmem:[%s6911_s1 + $0x50] sm:$0xff]   ;;  %v5783_v63 = vld [vmem:[%s6911_s1 + $0x48] sm:$0xff]  }
  0x20   : > { %v394_v4 = vld [vmem:[%s6168_s24] sm:$0xf]  ;;  %v395_v5 = vld [vmem:[%s6168_s24 + $0x4] sm:$0xf]  ;;  %v396_v6 = vld [vmem:[%s6168_s24 + $0x8] sm:$0xf] }
  0x21   : > { %v397_v7 = vmax.bf16 %v6077_v0, %v394_v4  ;;  %v398_v8 = vmax.bf16 %v6077_v0, %v395_v5  ;;  %v399_v9 = vmax.bf16 %v6077_v0, %v396_v6  ;;  %v409_v10 = vld [vmem:[%s6168_s24 + $0xc] sm:$0x1]  ;;  %5171 = vmatpush3.bf16.msra.mxu1 %v5773_v2  ;;  %v589_v27 = vld [vmem:[%s6168_s24] sm:$0xe]  ;;  %v5785_v1 = vld [vmem:[%s6912_s2 + $0x30] sm:$0xff]   ;;  %s5748_s18 = smul.u32 12, %s6930_s10 }
  0x22   : > { %v410_v11 = vmax.bf16 %v6077_v0, %v409_v10  ;;  %5172 = vmatprep.subr.bf16.mxu1 %v5774_v3  ;;  %v590_v29 = vld [vmem:[%s6168_s24 + $0xc] sm:$0x3]  ;;  %v591_v30 = vmax.bf16 %v6077_v0, %v589_v27  ;;  %5191 = vmatpush3.bf16.msra.mxu0 %v5778_v20  ;;  %v700_v36 = vld [vmem:[%s6168_s24] sm:$0xc]  ;;  %v5786_v2 = vld [vmem:[%s6912_s2 + $0x78] sm:$0xff]  }
  0x23   : > { %v400_v13 = vmin.bf16 %v6078_v12, %v397_v7  ;;  %v401_v14 = vmin.bf16 %v6078_v12, %v398_v8  ;;  %v6180_v15 = vmin.bf16 %v6078_v12, %v399_v9  ;;  %v592_v32 = vmax.bf16 %v6077_v0, %v590_v29  ;;  %5192 = vmatprep.subr.bf16.mxu0 %v5780_v24  ;;  %v5788_v4 = vld [vmem:[%s6912_s2 + $0x70] sm:$0xff]   ;;  %v5789_v5 = vld [vmem:[%s6912_s2 + $0x20] sm:$0xff]   ;;  %v5790_v6 = vld [vmem:[%s6912_s2 + $0x68] sm:$0xff]   ;;  %s347_s23 = scalar_lea.vmem %s6919_s9, %s5748_s18 }
  0x24   : > { %v411_v17 = vmin.bf16 %v6078_v12, %v410_v11  ;;  %v593_v35 = vmin.bf16 %v6078_v12, %v591_v30  ;;  %v701_v39 = vmax.bf16 %v6077_v0, %v700_v36  ;;  %v5784_v0 = vld [vmem:[%s6912_s2 + $0x38] sm:$0xff]   ;;  %v5792_v8 = vld [vmem:[%s6912_s2 + $0x60] sm:$0xff]   ;;  %v5793_v9 = vld [vmem:[%s6912_s2 + $0x10] sm:$0xff]  }
  0x25   : > { %v4564_v19 = vcombine.low %v400_v13, %v401_v14  ;;  %5173 = vmatpush3.bf16.msra.mxu1 %v5774_v3  ;;  %v594_v38 = vmin.bf16 %v6078_v12, %v592_v32  ;;  %v4571_v60 = vcombine.low %v6180_v15, %v6180_v15  ;;  %v5787_v3 = vld [vmem:[%s6912_s2 + $0x28] sm:$0xff]   ;;  %v5791_v7 = vld [vmem:[%s6912_s2 + $0x18] sm:$0xff]   ;;  %v5797_v13 = vld [vmem:[%s6912_s2] sm:$0xff]  }
  0x26   : > { %v4565_v21 = vcombine.low %v6180_v15, %v411_v17  ;;  %5178 = vmatprep.subr.bf16.mxu1 %v5775_v18  ;;  %v4577_v41 = vcombine.low %v593_v35, %v401_v14  ;;  %5193 = vmatpush3.bf16.msra.mxu0 %v5780_v24  ;;  %v702_v43 = vmin.bf16 %v6078_v12, %v701_v39  ;;  %v5794_v10 = vld [vmem:[%s6912_s2 + $0x58] sm:$0xff]   ;;  %v5795_v11 = vld [vmem:[%s6912_s2 + $0x8] sm:$0xff]   ;;  %v5796_v12 = vld [vmem:[%s6912_s2 + $0x50] sm:$0xff]  }
  0x27   : > { %v430_v22 = vshrl.u32 %v4564_v19, 16  ;;  %v432_v23 = vshll.u32 %v4564_v19, 16  ;;  %v4578_v42 = vcombine.low %v6180_v15, %v594_v38  ;;  %5208 = vmatprep.subr.bf16.mxu0 %v5786_v2  ;;  %v6275_v15 = vld [vmem:[%s6912_s2 + $0xf8] sm:$0xff]   ;;  %v5802_v16 = vld [vmem:[%s6912_s2 + $0x40] sm:$0xff]  }
  0x28   : > { %v437_v25 = vshll.u32 %v4565_v21, 16  ;;  %v441_v26 = vshrl.u32 %v4565_v21, 16  ;;  %v609_v44 = vshrl.u32 %v4577_v41, 16  ;;  %v612_v45 = vshll.u32 %v4577_v41, 16  ;;  %v6284_v17 = vld [vmem:[%s6912_s2 + $0xb8] sm:$0xff]  }
  0x29   : > { %v434_v28 = vrot.slane %v432_v23, 1  ;;  %v617_v47 = vshrl.u32 %v4578_v42, 16  ;;  %v620_v48 = vshll.u32 %v4578_v42, 16  ;;  %v4584_v49 = vcombine.low %v702_v43, %v401_v14  ;;  %v5798_v14 = vld [vmem:[%s6912_s2 + $0x48] sm:$0xff]  }
  0x2a   : > { %v439_v31 = vrot.slane %v437_v25, 1  ;;  %v611_v50 = vrot.slane %v609_v44, 1  ;;  %v614_v51 = vrot.slane %v612_v45, 2  ;;  %v714_v55 = vrot.slane %v4578_v42, 2 }
  0x2b   : > { %v435_v33 = vor.u32 %v434_v28, %v430_v22  ;;  %v619_v52 = vrot.slane %v617_v47, 1  ;;  %v622_v53 = vrot.slane %v620_v48, 2  ;;  %v713_v54 = vrot.slane %v4584_v49, 2 }
  0x2c   : > { %v443_v37 = vor.u32 %v441_v26, %v439_v31  ;;  %v615_v57 = vor.u32 %v614_v51, %v611_v50 }
  0x2d   : > { %v440_v40 = vsel %vm428_vm0, %v435_v33, %v439_v31  ;;  %v623_v58 = vor.u32 %v622_v53, %v619_v52  ;;  %v715_v62 = vsel %vm712_vm3, %v713_v54, %v714_v55 }
  0x2e   : > { %5174 = vmatprep.mubr.msk.bf16.mxu1 %vm462_vm1, %v440_v40 }
  0x2f   : > { %5175 = vmatmul.mubr.msk.bf16.vlgmr.msra.gmra.mxu1 %vm462_vm1, %v443_v37  ;;  %v624_v59 = vsel %vm607_vm2, %v615_v57, %v623_v58 }
  0x30   : > { %5179 = vmatpush3.bf16.msra.mxu1 %v5775_v18  ;;  %5184 = vmatprep.mubr.msk.bf16.mxu1 %vm462_vm1, %v4564_v19  ;;  %v352_v18 = vlaneseq }
  0x31   : > { %5180 = vmatprep.subr.bf16.mxu1 %v5777_v34  ;;  %5194 = vmatprep.mubr.msk.bf16.mxu0 %vm462_vm1, %v624_v59 }
  0x32   : > { %5195 = vmatmul.mubr.msk.bf16.vlgmr.msra.gmra.mxu0 %vm462_vm1, %v623_v58  ;;  %v353_v19 = vshrl.u32 %v352_v18, 7  ;;  %v360_v33 = vand.u32 127, %v352_v18 }
  0x33   : > { %5209 = vmatpush3.bf16.msra.mxu0 %v5786_v2 }
  0x34   : > { %5181 = vmatpush3.bf16.msra.mxu1 %v5777_v34  ;;  %5210 = vmatprep.subr.bf16.mxu0 %v5788_v4  ;;  %v355_v20 = vadd.s32 16, %v353_v19  ;;  %v356_v22 = vcvt.s32.f32 %v353_v19  ;;  %v354_v23 = vadd.s32 8, %v353_v19  ;;  %v361_v39 = vcvt.s32.f32 %v360_v33 }
  0x35   : > { %5182 = vmatprep.subr.bf16.mxu1 %v5779_v46 }
  0x36   : > { %v358_v21 = vcvt.s32.f32 %v355_v20  ;;  %v362_v26 = vadd.f32 0.5, %v356_v22  ;;  %v357_v27 = vcvt.s32.f32 %v354_v23  ;;  %v380_v48 = vmul.f32 0.03125, %v361_v39 }
  0x37   : > { %5211 = vmatpush3.bf16.msra.mxu0 %v5788_v4 }
  0x38   : > { %5183 = vmatpush3.bf16.msra.mxu1 %v5779_v46  ;;  %5212 = vmatprep.subr.bf16.mxu0 %v5790_v6  ;;  %v364_v24 = vadd.f32 0.5, %v358_v21  ;;  %v365_v31 = vmul.f32 0.33333334, %v362_v26  ;;  %v363_v32 = vadd.f32 0.5, %v357_v27  ;;  %v381_v53 = vfloor.f32 %v380_v48 }
  0x39   : > { %5198 = vmatprep.subr.bf16.mxu1 %v5781_v56 }
  0x3a   : > { %v367_v29 = vmul.f32 0.33333334, %v364_v24  ;;  %v368_v35 = vfloor.f32 %v365_v31  ;;  %v366_v36 = vmul.f32 0.33333334, %v363_v32 }
  0x3b   : > { %5185 = vmatmul.mubr.msk.bf16.vlgmr.msra.gmra.mxu1 %vm462_vm1, %v4571_v60  ;;  %5213 = vmatpush3.bf16.msra.mxu0 %v5790_v6 }
  0x3c   : > { %5199 = vmatpush3.bf16.msra.mxu1 %v5781_v56  ;;  %5204 = vmatprep.mubr.msk.bf16.mxu1 %vm462_vm1, %v715_v62  ;;  %v370_v34 = vfloor.f32 %v367_v29  ;;  %v371_v43 = vmul.f32 3.0, %v368_v35  ;;  %v369_v44 = vfloor.f32 %v366_v36  ;;  %v4590_v62 = vld [vmem:[%s6915_s5] ss:$0 sm:$0xff] }
  0x3d   : > { %5200 = vmatprep.subr.bf16.mxu1 %v5782_v61  ;;  %5214 = vmatprep.subr.bf16.mxu0 %v5792_v8 }
  0x3e   : > { %v373_v40 = vmul.f32 3.0, %v370_v34  ;;  %v374_v50 = vsub.f32 %v356_v22, %v371_v43  ;;  %v372_v51 = vmul.f32 3.0, %v369_v44 }
  0x3f   : > { %5215 = vmatpush3.bf16.msra.mxu0 %v5792_v8 }
  0x40   : > { %5201 = vmatpush3.bf16.msra.mxu1 %v5782_v61  ;;  %5216 = vmatprep.subr.bf16.mxu0 %v5794_v10  ;;  %v376_v47 = vsub.f32 %v358_v21, %v373_v40  ;;  %v375_v56 = vsub.f32 %v357_v27, %v372_v51 }
  0x41   : > { %5202 = vmatprep.subr.bf16.mxu1 %v5783_v63 }
  0x42   : > { %v379_v52 = vmul.f32 4.0, %v376_v47 }
  0x43   : > { %5217 = vmatpush3.bf16.msra.mxu0 %v5794_v10 }
  0x44   : > { %5203 = vmatpush3.bf16.msra.mxu1 %v5783_v63  ;;  %5218 = vmatprep.subr.bf16.mxu0 %v5796_v12  ;;  %v384_v59 = vadd.f32 %v381_v53, %v379_v52 }
  0x45   : > { %5228 = vmatprep.subr.bf16.mxu1 %v5784_v0 }
  0x46   : > { %vm387_vm4 = vcmp.gt.f32.partialorder %v384_v59, 0.5  ;;  %vm390_vm5 = vcmp.lt.f32.partialorder %v384_v59, 8.5 }
  0x47   : > { %5205 = vmatmul.mubr.msk.bf16.vlgmr.msra.gmra.mxu1 %vm462_vm1, %v714_v55  ;;  %5219 = vmatpush3.bf16.msra.mxu0 %v5796_v12  ;;  %v377_v55 = vmul.f32 4.0, %v374_v50  ;;  %vm6290_vm8 = vmand %vm387_vm4, %vm390_vm5  ;;  %vm823_vm1 = vcmask 1041408   ;;  %vm824_vm4 = vcmask 1045508  }
  0x48   : > { %5229 = vmatpush3.bf16.msra.mxu1 %v5784_v0  ;;  %5220 = vmatprep.subr.bf16.mxu0 %v5798_v14  ;;  %v378_v0 = vmul.f32 4.0, %v375_v56  ;;  %vm6308_vm5 = vmor %vm823_vm1, %vm824_vm4 }
  0x49   : > { %5230 = vmatprep.subr.bf16.mxu1 %v5785_v1  ;;  %v382_v63 = vadd.f32 %v381_v53, %v377_v55 }
  0x4b   : > { %5221 = vmatpush3.bf16.msra.mxu0 %v5798_v14  ;;  %vm385_vm6 = vcmp.gt.f32.partialorder %v382_v63, 0.5  ;;  %vm388_vm7 = vcmp.lt.f32.partialorder %v382_v63, 8.5 }
  0x4c   : > { %5231 = vmatpush3.bf16.msra.mxu1 %v5785_v1  ;;  %5222 = vmatprep.subr.bf16.mxu0 %v5802_v16  ;;  %vm6294_vm10 = vmand %vm385_vm6, %vm388_vm7  ;;  %vm1130_vm6 = vcmask 1046528   ;;  %vm1517_vm7 = vsmask.f32 5376 }
  0x4d   : > { %5232 = vmatprep.subr.bf16.mxu1 %v5787_v3 }
  0x4f   : > { %5223 = vmatpush3.bf16.msra.mxu0 %v5802_v16 }
  0x50   : > { %5233 = vmatpush3.bf16.msra.mxu1 %v5787_v3  ;;  %5248 = vmatprep.subr.bf16.mxu0 %v6284_v17 }
  0x51   : > { %5234 = vmatprep.subr.bf16.mxu1 %v5789_v5 }
  0x54   : > { %5235 = vmatpush3.bf16.msra.mxu1 %v5789_v5 }
  0x55   : > { %5236 = vmatprep.subr.bf16.mxu1 %v5791_v7 }
  0x58   : > { %5237 = vmatpush3.bf16.msra.mxu1 %v5791_v7 }
  0x59   : > { %5238 = vmatprep.subr.bf16.mxu1 %v5793_v9 }
  0x5c   : > { %5239 = vmatpush3.bf16.msra.mxu1 %v5793_v9  ;;  %v383_v9 = vadd.f32 %v381_v53, %v378_v0 }
  0x5d   : > { %5240 = vmatprep.subr.bf16.mxu1 %v5795_v11 }
  0x5e   : > { %vm386_vm12 = vcmp.gt.f32.partialorder %v383_v9, 0.5  ;;  %vm389_vm13 = vcmp.lt.f32.partialorder %v383_v9, 8.5 }
  0x5f   : > { %vm6302_vm14 = vmand %vm386_vm12, %vm389_vm13 }
  0x60   : > { %5241 = vmatpush3.bf16.msra.mxu1 %v5795_v11 }
  0x61   : > { %5242 = vmatprep.subr.bf16.mxu1 %v5797_v13 }
  0x64   : > { %5243 = vmatpush3.bf16.msra.mxu1 %v5797_v13 }
  0x65   : > { %5268 = vmatprep.subr.bf16.mxu1 %v6275_v15 }
  0xef   : > { %v5176_v25 = vpop.f32.mrf.mxu1 }
  0xf1   : > { %v503_v28 = vpop.f32.mrf.mxu1 }
  0xf2   : > { %v5196_v37 = vpop.f32.mrf.mxu0 }
  0xf3   : > { %v5177_v30 = vpop.f32.mrf.mxu1 }
  0xf4   : > { %v683_v41 = vpop.f32.mrf.mxu0 }
  0xf5   : > { %v506_v38 = vpop.f32.mrf.mxu1 }
  0xf6   : > { %v5197_v45 = vpop.f32.mrf.mxu0 }
  0xf7   : > { %v5803_v45 = vld [vmem:[%s6912_s2 + $0xf0] sm:$0xff]  }
  0xf8   : > { %v686_v4 = vpop.f32.mrf.mxu0 }
  0xfb   : > { %v5186_v42 = vpop.f32.mrf.mxu1 }
  0xfc   : > { %v584_v54 = vadd.f32 %v5186_v42, %v5176_v25 }
  0xfd   : > { %v575_v46 = vpop.f32.mrf.mxu1 }
  0xfe   : > { %v576_v57 = vadd.f32 %v575_v46, %v503_v28  ;;  %v699_v60 = vadd.f32 %v5196_v37, %v584_v54  ;;  %v5971_v28 = vld [vmem:[#allocation3 + $0xf0] sm:$0xff]  }
  0xff   : > { %v5187_v49 = vpop.f32.mrf.mxu1 }
 0x100   : > { %v697_v1 = vadd.f32 %v683_v41, %v576_v57 }
 0x101   : > { %v578_v58 = vpop.f32.mrf.mxu1 }
 0x102   : > { %v579_v2 = vadd.f32 %v578_v58, %v506_v38 }
 0x104   : > { %v698_v10 = vadd.f32 %v686_v4, %v579_v2 }
 0x107   : > { %v5206_v61 = vpop.f32.mrf.mxu1 }
 0x108   : > { %v790_v3 = vadd.f32 %v5206_v61, %v699_v60  ;;  %v5808_v60 = vld [vmem:[%s6912_s2 + $0xe8] sm:$0xff]  }
 0x109   : > { %v774_v5 = vpop.f32.mrf.mxu1 }
 0x10a   : > { %v800_v6 = vadd.f32 %v4590_v62, %v790_v3  ;;  %v788_v7 = vadd.f32 %v774_v5, %v697_v1 }
 0x10b   : > { %v5207_v8 = vpop.f32.mrf.mxu1 }
 0x10c   : > { %vm803_vm9 = vcmp.ge.f32.partialorder %v800_v6, 0.0  ;;  %v806_v12 = vmul.f32 0.2, %v800_v6  ;;  %v798_v13 = vadd.f32 %v4590_v62, %v788_v7 }
 0x10d   : > { %v777_v14 = vpop.f32.mrf.mxu1 }
 0x10e   : > { %v809_v16 = vsel %vm803_vm9, %v800_v6, %v806_v12  ;;  %vm801_vm11 = vcmp.ge.f32.partialorder %v798_v13, 0.0  ;;  %v804_v19 = vmul.f32 0.2, %v798_v13  ;;  %v789_v20 = vadd.f32 %v777_v14, %v698_v10  ;;  %v5810_v12 = vld [vmem:[%s6912_s2 + $0xb0] sm:$0xff]  }
 0x10f   : > { %v812_v21 = vsel %vm6290_vm8, %v809_v16, 0.0  ;;  %vm1781_vm9 = vsmask.f32 4352 }
 0x110   : > { %v4863_v22 = vpack.c.bf16 %v812_v21, %v812_v21  ;;  %v807_v23 = vsel %vm801_vm11, %v798_v13, %v804_v19  ;;  %v799_v24 = vadd.f32 %v4590_v62, %v789_v20  ;;  %v5811_v13 = vld [vmem:[%s6912_s2 + $0xe0] sm:$0xff]   ;;  %v5812_v19 = vld [vmem:[%s6912_s2 + $0xa8] sm:$0xff]   ;;  %v5813_v20 = vld [vmem:[%s6912_s2 + $0xd8] sm:$0xff]   ;;  %vm1656_vm11 = vcmask 1044480  }
 0x111   : > { %v810_v25 = vsel %vm6294_vm10, %v807_v23, 0.0  ;;  %v5815_v21 = vld [vmem:[%s6912_s2 + $0xd0] sm:$0xff]  }
 0x112   : > { %v831_v26 = vrot.slane %v4863_v22, 6  ;;  %v4861_v27 = vpack.c.bf16 %v810_v25, %v810_v25  ;;  %vm802_vm15 = vcmp.ge.f32.partialorder %v799_v24, 0.0  ;;  %v805_v29 = vmul.f32 0.2, %v799_v24 }
 0x114   : > { %v833_v30 = vrot.slane %v831_v26, 4  ;;  %v826_v31 = vrot.slane %v4861_v27, 6  ;;  %v808_v32 = vsel %vm802_vm15, %v799_v24, %v805_v29  ;;  %v5816_v24 = vld [vmem:[%s6912_s2 + $0x98] sm:$0xff]  }
 0x115   : > { %v811_v33 = vsel %vm6302_vm14, %v808_v32, 0.0  ;;  %v5819_v32 = vld [vmem:[%s6912_s2 + $0xc0] sm:$0xff]  }
 0x116   : > { %841 = vst [vmem:[#allocation2 + $0xc] sm:$0x3] %v833_v30  ;;  %838 = vst [vmem:[#allocation2] sm:$0xc] %v826_v31  ;;  %v4862_v34 = vpack.c.bf16 %v811_v33, %v811_v33  ;;  %v827_v36 = vrot.slane %v826_v31, 4  ;;  %v5818_v31 = vld [vmem:[%s6912_s2 + $0x90] sm:$0xff]  }
 0x118   : > { %v828_v37 = vrot.slane %v4862_v34, 6 }
 0x11a   : > { %v829_v38 = vsel %vm6308_vm5, %v827_v36, %v828_v37  ;;  %v830_v39 = vrot.slane %v828_v37, 4 }
 0x11b   : > { %839 = vst [vmem:[#allocation2 + $0x4] sm:$0xf] %v829_v38  ;;  %v5820_v38 = vld [vmem:[%s6912_s2 + $0x88] sm:$0xff]  }
 0x11c   : > { %v832_v40 = vsel %vm6308_vm5, %v830_v39, %v831_v26  ;;  %v5817_v26 = vld [vmem:[%s6912_s2 + $0xc8] sm:$0xff]   ;;  %v5821_v39 = vld [vmem:[%s6912_s2 + $0x178] sm:$0xff]  }
 0x11d   : > { %840 = vst [vmem:[#allocation2 + $0x8] sm:$0xf] %v832_v40  ;;  %v861_v41 = vld [vmem:[#allocation2] sm:$0xf]  ;;  %v864_v46 = vld [vmem:[#allocation2 + $0xc] sm:$0x1] }
 0x11e   : > { %v1110_v42 = vld [vmem:[#allocation2] sm:$0xe]  ;;  %v1235_v53 = vld [vmem:[#allocation2 + $0xc] sm:$0x3] }
 0x11f   : > { %v1497_v22 = vld [vmem:[#allocation2 + $0xc] sm:$0x7]  ;;  %v1373_v25 = vld [vmem:[#allocation2] sm:$0xc] }
 0x122   : > { %v5799_v43 = vld [vmem:[#allocation2] sm:$0xff]  }
 0x123   : > { %v6316_v44 = vld [vmem:[#allocation2 + $0x4] sm:$0xf]  ;;  %5244 = vmatprep.mubr.bf16.mxu1 %v5799_v43 }
 0x124   : > { %v4594_v47 = vcombine.low %v861_v41, %v6316_v44  ;;  %v4614_v48 = vcombine.low %v1110_v42, %v6316_v44  ;;  %v5801_v49 = vld [vmem:[#allocation2 + $0x8] ss:$0 sps:$4 sm:$0xff]   ;;  %v4632_v27 = vcombine.low %v1373_v25, %v6316_v44 }
 0x125   : > { %v6323_v50 = vld [vmem:[#allocation2 + $0x8] sm:$0xf]  ;;  %5245 = vmatmul.mubr.bf16.vlgmr.msra.gmra.mxu1 %v5801_v49 }
 0x126   : > { %v6326_v51 = vcombine.low %v6323_v50, %v864_v46  ;;  %v894_v52 = vshll.u32 %v4594_v47, 16  ;;  %v6329_v54 = vcombine.low %v6323_v50, %v1235_v53  ;;  %v1256_v55 = vshrl.u32 %v4614_v48, 16  ;;  %5269 = vmatpush3.bf16.msra.mxu1 %v6275_v15  ;;  %v5825_v46 = vld [vmem:[%s6912_s2 + $0x170] sm:$0xff]   ;;  %v5827_v49 = vld [vmem:[%s6912_s2 + $0x168] sm:$0xff]  }
 0x127   : > { %v1259_v56 = vshll.u32 %v4614_v48, 16  ;;  %v892_v57 = vshrl.u32 %v4594_v47, 16  ;;  %5270 = vmatprep.subr.bf16.mxu1 %v5803_v45  ;;  %v1131_v8 = vrot.slane %v4614_v48, 1  ;;  %v6365_v23 = vcombine.low %v6323_v50, %v1497_v22  ;;  %v5826_v48 = vld [vmem:[%s6912_s2 + $0x138] sm:$0xff]  }
 0x128   : > { %v896_v58 = vrot.slane %v894_v52, 1  ;;  %v899_v59 = vshll.u32 %v6326_v51, 16  ;;  %v1258_v61 = vrot.slane %v1256_v55, 1  ;;  %v1264_v63 = vshrl.u32 %v6329_v54, 16  ;;  %v5828_v55 = vld [vmem:[%s6912_s2 + $0x130] sm:$0xff]   ;;  %v5844_v22 = vld [vmem:[%s6912_s2 + $0x1b8] sm:$0xff]  }
 0x129   : > { %v1261_v62 = vrot.slane %v1259_v56, 2  ;;  %v1267_v0 = vshll.u32 %v6329_v54, 16  ;;  %v903_v3 = vshrl.u32 %v6326_v51, 16  ;;  %v1132_v15 = vrot.slane %v6326_v51, 1  ;;  %v5829_v56 = vld [vmem:[%s6912_s2 + $0x160] sm:$0xff]  }
 0x12a   : > { %v897_v1 = vor.u32 %v896_v58, %v892_v57  ;;  %v901_v2 = vrot.slane %v899_v59, 1  ;;  %v1266_v4 = vrot.slane %v1264_v63, 1  ;;  %5271 = vmatpush3.bf16.msra.mxu1 %v5803_v45  ;;  %v1527_v29 = vshrl.u32 %v6365_v23, 16  ;;  %v5824_v45 = vld [vmem:[%s6912_s2 + $0x80] sm:$0xff]   ;;  %v5830_v58 = vld [vmem:[%s6912_s2 + $0x128] sm:$0xff]   ;;  %v5831_v59 = vld [vmem:[%s6912_s2 + $0x158] sm:$0xff]  }
 0x12b   : > { %v1269_v5 = vrot.slane %v1267_v0, 2  ;;  %5272 = vmatprep.subr.bf16.mxu1 %v5808_v60  ;;  %v1262_v9 = vor.u32 %v1261_v62, %v1258_v61  ;;  %v1133_v14 = vsel %vm1130_vm6, %v1131_v8, %v1132_v15  ;;  %v1530_v30 = vshll.u32 %v6365_v23, 16  ;;  %v5832_v51 = vld [vmem:[%s6912_s2 + $0x120] sm:$0xff]   ;;  %v6428_v61 = vld [vmem:[#allocation2 + $0xc] sm:$0xf]  ;;  %v5834_v63 = vld [vmem:[%s6912_s2 + $0x118] sm:$0xff]  }
 0x12c   : > { %v902_v6 = vsel %vm428_vm0, %v897_v1, %v901_v2  ;;  %v905_v7 = vor.u32 %v903_v3, %v901_v2  ;;  %v1519_v33 = vshrl.u32 %v4632_v27, 16  ;;  %v1522_v34 = vshll.u32 %v4632_v27, 16  ;;  %v1636_v0 = vld [vmem:[#allocation2] sm:$0x8]  ;;  %v5835_v1 = vld [vmem:[%s6912_s2 + $0x148] sm:$0xff]  }
 0x12d   : > { %5224 = vmatprep.mubr.bf16.mxu0 %v902_v6  ;;  %v1270_v10 = vor.u32 %v1269_v5, %v1266_v4  ;;  %v1529_v36 = vrot.slane %v1527_v29, 2  ;;  %v1532_v37 = vrot.slane %v1530_v30, 3  ;;  %v1394_v52 = vrot.slane %v6329_v54, 2  ;;  %v5836_v4 = vld [vmem:[%s6912_s2 + $0x110] sm:$0xff]   ;;  %v5837_v5 = vld [vmem:[%s6912_s2 + $0x140] sm:$0xff]  }
 0x12e   : > { %5225 = vmatmul.mubr.bf16.vlgmr.msra.gmra.mxu0 %v905_v7  ;;  %5273 = vmatpush3.bf16.msra.mxu1 %v5808_v60  ;;  %v1521_v40 = vrot.slane %v1519_v33, 2  ;;  %v1524_v41 = vrot.slane %v1522_v34, 3  ;;  %v1393_v53 = vrot.slane %v4632_v27, 2  ;;  %v5833_v60 = vld [vmem:[%s6912_s2 + $0x150] sm:$0xff]   ;;  %v4659_v62 = vcombine.low %v6323_v50, %v6428_v61  ;;  %v5847_v29 = vld [vmem:[%s6912_s2 + $0x1e0] sm:$0xff]   ;;  %v5852_v33 = vld [vmem:[%s6912_s2 + $0x198] sm:$0xff]  }
 0x12f   : > { %5249 = vmatpush3.bf16.msra.mxu0 %v6284_v17  ;;  %5264 = vmatprep.mubr.bf16.mxu0 %v1133_v14  ;;  %v1271_v16 = vsel %vm607_vm2, %v1262_v9, %v1270_v10  ;;  %v5814_v17 = vld [vmem:[%s6912_s2 + $0xa0] sm:$0xff]   ;;  %v6388_v42 = vor.u32 %v1532_v37, %v1529_v36  ;;  %v4650_v2 = vcombine.low %v1636_v0, %v6316_v44  ;;  %v1658_v25 = vrot.slane %v6365_v23, 3  ;;  %v5846_v27 = vld [vmem:[%s6912_s2 + $0x1b0] sm:$0xff]   ;;  %v5848_v23 = vld [vmem:[%s6912_s2 + $0x1a8] sm:$0xff]  }
 0x130   : > { %5284 = vmatprep.mubr.bf16.mxu1 %v1271_v16  ;;  %5250 = vmatprep.subr.bf16.mxu0 %v5810_v12  ;;  %v1525_v43 = vor.u32 %v1524_v41, %v1521_v40  ;;  %v1395_v57 = vsel %vm712_vm3, %v1393_v53, %v1394_v52  ;;  %v1791_v3 = vshrl.u32 %v4659_v62, 16  ;;  %v5850_v54 = vld [vmem:[%s6912_s2 + $0x1a0] sm:$0xff]   ;;  %v5853_v34 = vld [vmem:[%s6912_s2 + $0x1c8] sm:$0xff]   ;;  %v5854_v36 = vld [vmem:[%s6912_s2 + $0x190] sm:$0xff]  }
 0x131   : > { %5274 = vmatprep.subr.bf16.mxu1 %v5811_v13  ;;  %v1783_v6 = vshrl.u32 %v4650_v2, 16  ;;  %v1786_v7 = vshll.u32 %v4650_v2, 16  ;;  %v5855_v37 = vld [vmem:[%s6912_s2 + $0x1c0] sm:$0xff]   ;;  %v5858_v40 = vld [vmem:[%s6912_s2 + $0x238] sm:$0xff]   ;;  %v5860_v41 = vld [vmem:[%s6912_s2 + $0x230] sm:$0xff]  }
 0x132   : > { %5275 = vmatpush3.bf16.msra.mxu1 %v5811_v13  ;;  %v1534_v47 = vsel %vm1517_vm7, %v1525_v43, %v6388_v42  ;;  %v1793_v8 = vrot.slane %v1791_v3, 3  ;;  %v5861_v43 = vld [vmem:[%s6912_s2 + $0x228] sm:$0xff]   ;;  %v5870_v0 = vld [vmem:[%s6913_s3 + $0x78] sm:$0xff]   ;;  %v5873_v3 = vld [vmem:[%s6913_s3 + $0x20] sm:$0xff]  }
 0x133   : > { %5251 = vmatpush3.bf16.msra.mxu0 %v5810_v12  ;;  %5276 = vmatprep.subr.bf16.mxu1 %v5813_v20  ;;  %v5839_v12 = vld [vmem:[%s6912_s2 + $0x1f8] sm:$0xff]   ;;  %v1785_v13 = vrot.slane %v1783_v6, 3  ;;  %v1788_v14 = vrot.slane %v1786_v7, 4  ;;  %v5877_v6 = vld [vmem:[%s6913_s3 + $0x10] sm:$0xff]  }
 0x134   : > { %5252 = vmatprep.subr.bf16.mxu0 %v5812_v19 }
 0x136   : > { %5277 = vmatpush3.bf16.msra.mxu1 %v5813_v20  ;;  %v5842_v20 = vld [vmem:[%s6912_s2 + $0x100] sm:$0xff]  }
 0x137   : > { %5253 = vmatpush3.bf16.msra.mxu0 %v5812_v19  ;;  %5278 = vmatprep.subr.bf16.mxu1 %v5815_v21  ;;  %v1789_v19 = vor.u32 %v1788_v14, %v1785_v13  ;;  %v5880_v13 = vld [vmem:[%s6913_s3 + $0x50] sm:$0xff]   ;;  %v5881_v14 = vld [vmem:[%s6913_s3] sm:$0xff]  }
 0x138   : > { %5254 = vmatprep.subr.bf16.mxu0 %v5814_v17 }
 0x13a   : > { %5279 = vmatpush3.bf16.msra.mxu1 %v5815_v21 }
 0x13b   : > { %5255 = vmatpush3.bf16.msra.mxu0 %v5814_v17  ;;  %5280 = vmatprep.subr.bf16.mxu1 %v5817_v26  ;;  %v5843_v17 = vld [vmem:[%s6912_s2 + $0x1f0] sm:$0xff]  }
 0x13c   : > { %5256 = vmatprep.subr.bf16.mxu0 %v5816_v24 }
 0x13e   : > { %5281 = vmatpush3.bf16.msra.mxu1 %v5817_v26  ;;  %v1657_v26 = vrot.slane %v4650_v2, 3  ;;  %v5872_v2 = vld [vmem:[%s6913_s3 + $0x70] sm:$0xff]  }
 0x13f   : > { %5257 = vmatpush3.bf16.msra.mxu0 %v5816_v24  ;;  %5282 = vmatprep.subr.bf16.mxu1 %v5819_v32  ;;  %v5845_v24 = vld [vmem:[%s6912_s2 + $0x1e8] sm:$0xff]  }
 0x140   : > { %5258 = vmatprep.subr.bf16.mxu0 %v5818_v31  ;;  %v1659_v30 = vsel %vm1656_vm11, %v1657_v26, %v1658_v25 }
 0x142   : > { %5283 = vmatpush3.bf16.msra.mxu1 %v5819_v32  ;;  %v5851_v32 = vld [vmem:[%s6912_s2 + $0x1d0] sm:$0xff]  }
 0x143   : > { %5259 = vmatpush3.bf16.msra.mxu0 %v5818_v31  ;;  %5308 = vmatprep.subr.bf16.mxu1 %v5821_v39  ;;  %v5849_v31 = vld [vmem:[%s6912_s2 + $0x1d8] sm:$0xff]  }
 0x144   : > { %5260 = vmatprep.subr.bf16.mxu0 %v5820_v38 }
 0x145   : > { %5285 = vmatmul.mubr.bf16.vlgmr.msra.gmra.mxu1 %v1270_v10  ;;  %v5838_v10 = vld [vmem:[%s6912_s2 + $0x108] sm:$0xff]  }
 0x146   : > { %5309 = vmatpush3.bf16.msra.mxu1 %v5821_v39  ;;  %5324 = vmatprep.mubr.bf16.mxu1 %v1534_v47  ;;  %v5857_v39 = vld [vmem:[%s6912_s2 + $0x180] sm:$0xff]  }
 0x147   : > { %5261 = vmatpush3.bf16.msra.mxu0 %v5820_v38  ;;  %5310 = vmatprep.subr.bf16.mxu1 %v5825_v46  ;;  %v5856_v38 = vld [vmem:[%s6912_s2 + $0x188] sm:$0xff]   ;;  %v5866_v47 = vld [vmem:[%s6912_s2 + $0x200] sm:$0xff]  }
 0x148   : > { %5262 = vmatprep.subr.bf16.mxu0 %v5824_v45 }
 0x14a   : > { %5311 = vmatpush3.bf16.msra.mxu1 %v5825_v46  ;;  %v5865_v46 = vld [vmem:[%s6912_s2 + $0x208] sm:$0xff]  }
 0x14b   : > { %5263 = vmatpush3.bf16.msra.mxu0 %v5824_v45  ;;  %5312 = vmatprep.subr.bf16.mxu1 %v5827_v49  ;;  %v5862_v45 = vld [vmem:[%s6912_s2 + $0x220] sm:$0xff]  }
 0x14c   : > { %5288 = vmatprep.subr.bf16.mxu0 %v5826_v48 }
 0x14e   : > { %5265 = vmatmul.mubr.bf16.vlgmr.msra.gmra.mxu0 %v1132_v15  ;;  %5313 = vmatpush3.bf16.msra.mxu1 %v5827_v49  ;;  %v1794_v15 = vshll.u32 %v4659_v62, 16  ;;  %v5868_v49 = vld [vmem:[%s6913_s3 + $0x38] sm:$0xff]  }
 0x14f   : > { %5289 = vmatpush3.bf16.msra.mxu0 %v5826_v48  ;;  %5304 = vmatprep.mubr.bf16.mxu0 %v1395_v57  ;;  %v4669_v48 = vcombine.low %v6428_v61, %v6428_v61  ;;  %v5869_v61 = vld [vmem:[%s6913_s3 + $0x30] sm:$0xff]  }
 0x150   : > { %5290 = vmatprep.subr.bf16.mxu0 %v5828_v55  ;;  %5314 = vmatprep.subr.bf16.mxu1 %v5829_v56  ;;  %v1796_v9 = vrot.slane %v1794_v15, 4  ;;  %v5874_v15 = vld [vmem:[%s6913_s3 + $0x68] sm:$0xff]  }
 0x152   : > { %5315 = vmatpush3.bf16.msra.mxu1 %v5829_v56  ;;  %v1797_v16 = vor.u32 %v1796_v9, %v1793_v8  ;;  %v5878_v8 = vld [vmem:[%s6913_s3 + $0x58] sm:$0xff]  }
 0x153   : > { %5291 = vmatpush3.bf16.msra.mxu0 %v5828_v55  ;;  %5316 = vmatprep.subr.bf16.mxu1 %v5831_v59 }
 0x154   : > { %5292 = vmatprep.subr.bf16.mxu0 %v5830_v58  ;;  %v1798_v21 = vsel %vm1781_vm9, %v1789_v19, %v1797_v16 }
 0x156   : > { %5317 = vmatpush3.bf16.msra.mxu1 %v5831_v59 }
 0x157   : > { %5293 = vmatpush3.bf16.msra.mxu0 %v5830_v58  ;;  %5318 = vmatprep.subr.bf16.mxu1 %v5833_v60 }
 0x158   : > { %5294 = vmatprep.subr.bf16.mxu0 %v5832_v51 }
 0x15a   : > { %5319 = vmatpush3.bf16.msra.mxu1 %v5833_v60 }
 0x15b   : > { %5295 = vmatpush3.bf16.msra.mxu0 %v5832_v51  ;;  %5320 = vmatprep.subr.bf16.mxu1 %v5835_v1 }
 0x15c   : > { %5296 = vmatprep.subr.bf16.mxu0 %v5834_v63 }
 0x15e   : > { %5321 = vmatpush3.bf16.msra.mxu1 %v5835_v1  ;;  %v5871_v1 = vld [vmem:[%s6913_s3 + $0x28] sm:$0xff]  }
 0x15f   : > { %5297 = vmatpush3.bf16.msra.mxu0 %v5834_v63  ;;  %5322 = vmatprep.subr.bf16.mxu1 %v5837_v5 }
 0x160   : > { %5298 = vmatprep.subr.bf16.mxu0 %v5836_v4 }
 0x162   : > { %5323 = vmatpush3.bf16.msra.mxu1 %v5837_v5  ;;  %v5876_v5 = vld [vmem:[%s6913_s3 + $0x60] sm:$0xff]  }
 0x163   : > { %5299 = vmatpush3.bf16.msra.mxu0 %v5836_v4  ;;  %5348 = vmatprep.subr.bf16.mxu1 %v5839_v12  ;;  %v5875_v4 = vld [vmem:[%s6913_s3 + $0x18] sm:$0xff]  }
 0x164   : > { %5300 = vmatprep.subr.bf16.mxu0 %v5838_v10 }
 0x165   : > { %5325 = vmatmul.mubr.bf16.vlgmr.msra.gmra.mxu1 %v6388_v42  ;;  %v4668_v42 = vcombine.low %v6316_v44, %v6323_v50  ;;  %v5863_v44 = vld [vmem:[%s6912_s2 + $0x218] sm:$0xff]   ;;  %v5864_v50 = vld [vmem:[%s6912_s2 + $0x210] sm:$0xff]  }
 0x166   : > { %5349 = vmatpush3.bf16.msra.mxu1 %v5839_v12  ;;  %5364 = vmatprep.mubr.bf16.mxu1 %v1798_v21 }
 0x167   : > { %5301 = vmatpush3.bf16.msra.mxu0 %v5838_v10  ;;  %5350 = vmatprep.subr.bf16.mxu1 %v5843_v17  ;;  %v5879_v10 = vld [vmem:[%s6913_s3 + $0x8] sm:$0xff]  }
 0x168   : > { %5302 = vmatprep.subr.bf16.mxu0 %v5842_v20 }
 0x16a   : > { %5351 = vmatpush3.bf16.msra.mxu1 %v5843_v17  ;;  %v5882_v17 = vld [vmem:[%s6913_s3 + $0x48] sm:$0xff]  }
 0x16b   : > { %5303 = vmatpush3.bf16.msra.mxu0 %v5842_v20  ;;  %5352 = vmatprep.subr.bf16.mxu1 %v5845_v24 }
 0x16c   : > { %5328 = vmatprep.subr.bf16.mxu0 %v5844_v22 }
 0x16e   : > { %5305 = vmatmul.mubr.bf16.vlgmr.msra.gmra.mxu0 %v1394_v52  ;;  %5353 = vmatpush3.bf16.msra.mxu1 %v5845_v24  ;;  %v6581_v24 = vld [vmem:[%s6913_s3 + $0xf8] sm:$0xff]  }
 0x16f   : > { %5329 = vmatpush3.bf16.msra.mxu0 %v5844_v22  ;;  %5344 = vmatprep.mubr.bf16.mxu0 %v1659_v30 }
 0x170   : > { %5330 = vmatprep.subr.bf16.mxu0 %v5846_v27  ;;  %5354 = vmatprep.subr.bf16.mxu1 %v5847_v29 }
 0x172   : > { %5355 = vmatpush3.bf16.msra.mxu1 %v5847_v29  ;;  %v5886_v29 = vld [vmem:[%s6913_s3 + $0x40] sm:$0xff]  }
 0x173   : > { %5331 = vmatpush3.bf16.msra.mxu0 %v5846_v27  ;;  %5356 = vmatprep.subr.bf16.mxu1 %v5849_v31 }
 0x174   : > { %5332 = vmatprep.subr.bf16.mxu0 %v5848_v23 }
 0x176   : > { %5357 = vmatpush3.bf16.msra.mxu1 %v5849_v31 }
 0x177   : > { %5333 = vmatpush3.bf16.msra.mxu0 %v5848_v23  ;;  %5358 = vmatprep.subr.bf16.mxu1 %v5851_v32 }
 0x178   : > { %5334 = vmatprep.subr.bf16.mxu0 %v5850_v54 }
 0x17a   : > { %5359 = vmatpush3.bf16.msra.mxu1 %v5851_v32 }
 0x17b   : > { %5335 = vmatpush3.bf16.msra.mxu0 %v5850_v54  ;;  %5360 = vmatprep.subr.bf16.mxu1 %v5853_v34  ;;  %v6590_v54 = vld [vmem:[%s6913_s3 + $0xb8] sm:$0xff]  }
 0x17c   : > { %5336 = vmatprep.subr.bf16.mxu0 %v5852_v33 }
 0x17e   : > { %5361 = vmatpush3.bf16.msra.mxu1 %v5853_v34 }
 0x17f   : > { %5337 = vmatpush3.bf16.msra.mxu0 %v5852_v33  ;;  %5362 = vmatprep.subr.bf16.mxu1 %v5855_v37 }
 0x180   : > { %5338 = vmatprep.subr.bf16.mxu0 %v5854_v36 }
 0x182   : > { %5363 = vmatpush3.bf16.msra.mxu1 %v5855_v37 }
 0x183   : > { %5339 = vmatpush3.bf16.msra.mxu0 %v5854_v36  ;;  %5388 = vmatprep.subr.bf16.mxu1 %v5870_v0 }
 0x184   : > { %5340 = vmatprep.subr.bf16.mxu0 %v5856_v38 }
 0x185   : > { %5365 = vmatmul.mubr.bf16.vlgmr.msra.gmra.mxu1 %v1797_v16 }
 0x186   : > { %5389 = vmatpush3.bf16.msra.mxu1 %v5870_v0 }
 0x187   : > { %5341 = vmatpush3.bf16.msra.mxu0 %v5856_v38  ;;  %5390 = vmatprep.subr.bf16.mxu1 %v5872_v2 }
 0x188   : > { %5342 = vmatprep.subr.bf16.mxu0 %v5857_v39 }
 0x18a   : > { %5391 = vmatpush3.bf16.msra.mxu1 %v5872_v2 }
 0x18b   : > { %5343 = vmatpush3.bf16.msra.mxu0 %v5857_v39  ;;  %5392 = vmatprep.subr.bf16.mxu1 %v5874_v15 }
 0x18c   : > { %5368 = vmatprep.subr.bf16.mxu0 %v5858_v40 }
 0x18e   : > { %5345 = vmatmul.mubr.bf16.vlgmr.msra.gmra.mxu0 %v1658_v25  ;;  %5393 = vmatpush3.bf16.msra.mxu1 %v5874_v15 }
 0x18f   : > { %5369 = vmatpush3.bf16.msra.mxu0 %v5858_v40  ;;  %5384 = vmatprep.mubr.bf16.mxu0 %v4668_v42 }
 0x190   : > { %5370 = vmatprep.subr.bf16.mxu0 %v5860_v41  ;;  %5394 = vmatprep.subr.bf16.mxu1 %v5876_v5 }
 0x192   : > { %5395 = vmatpush3.bf16.msra.mxu1 %v5876_v5 }
 0x193   : > { %5371 = vmatpush3.bf16.msra.mxu0 %v5860_v41  ;;  %5396 = vmatprep.subr.bf16.mxu1 %v5878_v8 }
 0x194   : > { %5372 = vmatprep.subr.bf16.mxu0 %v5861_v43 }
 0x196   : > { %5397 = vmatpush3.bf16.msra.mxu1 %v5878_v8 }
 0x197   : > { %5373 = vmatpush3.bf16.msra.mxu0 %v5861_v43  ;;  %5398 = vmatprep.subr.bf16.mxu1 %v5880_v13 }
 0x198   : > { %5374 = vmatprep.subr.bf16.mxu0 %v5862_v45 }
 0x19a   : > { %5399 = vmatpush3.bf16.msra.mxu1 %v5880_v13 }
 0x19b   : > { %5375 = vmatpush3.bf16.msra.mxu0 %v5862_v45  ;;  %5400 = vmatprep.subr.bf16.mxu1 %v5882_v17 }
 0x19c   : > { %5376 = vmatprep.subr.bf16.mxu0 %v5863_v44 }
 0x19e   : > { %5401 = vmatpush3.bf16.msra.mxu1 %v5882_v17 }
 0x19f   : > { %5377 = vmatpush3.bf16.msra.mxu0 %v5863_v44  ;;  %5402 = vmatprep.subr.bf16.mxu1 %v5886_v29 }
 0x1a0   : > { %5378 = vmatprep.subr.bf16.mxu0 %v5864_v50 }
 0x1a2   : > { %5403 = vmatpush3.bf16.msra.mxu1 %v5886_v29 }
 0x1a3   : > { %5379 = vmatpush3.bf16.msra.mxu0 %v5864_v50  ;;  %5428 = vmatprep.subr.bf16.mxu1 %v6590_v54 }
 0x1a4   : > { %5380 = vmatprep.subr.bf16.mxu0 %v5865_v46 }
 0x1a7   : > { %5381 = vmatpush3.bf16.msra.mxu0 %v5865_v46 }
 0x1a8   : > { %5382 = vmatprep.subr.bf16.mxu0 %v5866_v47 }
 0x1ab   : > { %5383 = vmatpush3.bf16.msra.mxu0 %v5866_v47 }
 0x1ac   : > { %5408 = vmatprep.subr.bf16.mxu0 %v5868_v49 }
 0x1ae   : > { %5385 = vmatmul.mubr.bf16.vlgmr.msra.gmra.mxu0 %v4669_v48 }
 0x1af   : > { %5409 = vmatpush3.bf16.msra.mxu0 %v5868_v49 }
 0x1b0   : > { %5410 = vmatprep.subr.bf16.mxu0 %v5869_v61 }
 0x1b3   : > { %5411 = vmatpush3.bf16.msra.mxu0 %v5869_v61 }
 0x1b4   : > { %5412 = vmatprep.subr.bf16.mxu0 %v5871_v1 }
 0x1b7   : > { %5413 = vmatpush3.bf16.msra.mxu0 %v5871_v1 }
 0x1b8   : > { %5414 = vmatprep.subr.bf16.mxu0 %v5873_v3 }
 0x1bb   : > { %5415 = vmatpush3.bf16.msra.mxu0 %v5873_v3 }
 0x1bc   : > { %5416 = vmatprep.subr.bf16.mxu0 %v5875_v4 }
 0x1bf   : > { %5417 = vmatpush3.bf16.msra.mxu0 %v5875_v4 }
 0x1c0   : > { %5418 = vmatprep.subr.bf16.mxu0 %v5877_v6 }
 0x1c3   : > { %5419 = vmatpush3.bf16.msra.mxu0 %v5877_v6 }
 0x1c4   : > { %5420 = vmatprep.subr.bf16.mxu0 %v5879_v10 }
 0x1c7   : > { %5421 = vmatpush3.bf16.msra.mxu0 %v5879_v10 }
 0x1c8   : > { %5422 = vmatprep.subr.bf16.mxu0 %v5881_v14 }
 0x1cb   : > { %5423 = vmatpush3.bf16.msra.mxu0 %v5881_v14 }
 0x1cc   : > { %5448 = vmatprep.subr.bf16.mxu0 %v6581_v24 }
 0x1e5   : > { %v5246_v52 = vpop.f32.mrf.mxu1 }
 0x1e7   : > { %v1096_v53 = vpop.f32.mrf.mxu1 }
 0x1e9   : > { %v5247_v55 = vpop.f32.mrf.mxu1 }
 0x1eb   : > { %v1099_v60 = vpop.f32.mrf.mxu1 }
 0x1ee   : > { %v5226_v56 = vpop.f32.mrf.mxu0 }
 0x1ef   : > { %v1105_v57 = vadd.f32 %v5246_v52, %v5226_v56 }
 0x1f0   : > { %v990_v58 = vpop.f32.mrf.mxu0 }
 0x1f1   : > { %v1097_v59 = vadd.f32 %v1096_v53, %v990_v58 }
 0x1f2   : > { %v5227_v51 = vpop.f32.mrf.mxu0 }
 0x1f3   : > { %v4678_v51 = vld [vmem:[%s6916_s6] ss:$0 sm:$0xff] }
 0x1f4   : > { %v993_v62 = vpop.f32.mrf.mxu0 }
 0x1f5   : > { %v1100_v63 = vadd.f32 %v1099_v60, %v993_v62 }
 0x205   : > { %v5286_v7 = vpop.f32.mrf.mxu1 }
 0x207   : > { %v1356_v9 = vpop.f32.mrf.mxu1 }
 0x209   : > { %v5287_v12 = vpop.f32.mrf.mxu1 }
 0x20b   : > { %v1359_v23 = vpop.f32.mrf.mxu1 }
 0x20e   : > { %v5266_v16 = vpop.f32.mrf.mxu0 }
 0x20f   : > { %v1234_v19 = vadd.f32 %v5266_v16, %v1105_v57 }
 0x210   : > { %v1218_v20 = vpop.f32.mrf.mxu0 }
 0x211   : > { %v1232_v21 = vadd.f32 %v1218_v20, %v1097_v59  ;;  %v1372_v22 = vadd.f32 %v5286_v7, %v1234_v19 }
 0x212   : > { %v5267_v25 = vpop.f32.mrf.mxu0 }
 0x213   : > { %v1370_v26 = vadd.f32 %v1356_v9, %v1232_v21 }
 0x214   : > { %v1221_v27 = vpop.f32.mrf.mxu0 }
 0x215   : > { %v1233_v30 = vadd.f32 %v1221_v27, %v1100_v63 }
 0x217   : > { %v1371_v31 = vadd.f32 %v1359_v23, %v1233_v30 }
 0x225   : > { %v5326_v32 = vpop.f32.mrf.mxu1 }
 0x227   : > { %v1619_v33 = vpop.f32.mrf.mxu1 }
 0x229   : > { %v5327_v34 = vpop.f32.mrf.mxu1 }
 0x22b   : > { %v1622_v43 = vpop.f32.mrf.mxu1 }
 0x22e   : > { %v5306_v36 = vpop.f32.mrf.mxu0 }
 0x22f   : > { %v1496_v37 = vadd.f32 %v5306_v36, %v1372_v22 }
 0x230   : > { %v1480_v38 = vpop.f32.mrf.mxu0 }
 0x231   : > { %v1494_v39 = vadd.f32 %v1480_v38, %v1370_v26  ;;  %v1635_v40 = vadd.f32 %v5326_v32, %v1496_v37  ;;  %v5887_v38 = vld [vmem:[%s6913_s3 + $0xf0] sm:$0xff]  }
 0x232   : > { %v5307_v41 = vpop.f32.mrf.mxu0 }
 0x233   : > { %v1633_v42 = vadd.f32 %v1619_v33, %v1494_v39 }
 0x234   : > { %v1483_v46 = vpop.f32.mrf.mxu0 }
 0x235   : > { %v1495_v52 = vadd.f32 %v1483_v46, %v1371_v31 }
 0x237   : > { %v1634_v57 = vadd.f32 %v1622_v43, %v1495_v52 }
 0x245   : > { %v5366_v45 = vpop.f32.mrf.mxu1 }
 0x247   : > { %v1883_v44 = vpop.f32.mrf.mxu1 }
 0x249   : > { %v5367_v50 = vpop.f32.mrf.mxu1 }
 0x24b   : > { %v1886_v2 = vpop.f32.mrf.mxu1 }
 0x24e   : > { %v5346_v47 = vpop.f32.mrf.mxu0 }
 0x24f   : > { %v1760_v53 = vadd.f32 %v5346_v47, %v1635_v40 }
 0x250   : > { %v1744_v48 = vpop.f32.mrf.mxu0 }
 0x251   : > { %v1758_v55 = vadd.f32 %v1744_v48, %v1633_v42  ;;  %v1899_v58 = vadd.f32 %v5366_v45, %v1760_v53 }
 0x252   : > { %v5347_v49 = vpop.f32.mrf.mxu0 }
 0x253   : > { %v1897_v63 = vadd.f32 %v1883_v44, %v1758_v55  ;;  %v5892_v55 = vld [vmem:[%s6913_s3 + $0xe8] sm:$0xff]  }
 0x254   : > { %v1747_v56 = vpop.f32.mrf.mxu0 }
 0x255   : > { %v1759_v60 = vadd.f32 %v1747_v56, %v1634_v57 }
 0x257   : > { %v1898_v5 = vadd.f32 %v1886_v2, %v1759_v60 }
 0x26e   : > { %v5386_v59 = vpop.f32.mrf.mxu0 }
 0x26f   : > { %v2018_v62 = vadd.f32 %v5386_v59, %v1899_v58 }
 0x270   : > { %v2002_v61 = vpop.f32.mrf.mxu0 }
 0x271   : > { %v2028_v0 = vadd.f32 %v4678_v51, %v2018_v62  ;;  %v2016_v1 = vadd.f32 %v2002_v61, %v1897_v63 }
 0x272   : > { %v5387_v3 = vpop.f32.mrf.mxu0 }
 0x273   : > { %vm2031_vm12 = vcmp.ge.f32.partialorder %v2028_v0, 0.0  ;;  %v2034_v15 = vmul.f32 0.2, %v2028_v0  ;;  %v2026_v4 = vadd.f32 %v4678_v51, %v2016_v1 }
 0x274   : > { %v2005_v6 = vpop.f32.mrf.mxu0 }
 0x275   : > { %v2037_v7 = vsel %vm2031_vm12, %v2028_v0, %v2034_v15  ;;  %vm2029_vm13 = vcmp.ge.f32.partialorder %v2026_v4, 0.0  ;;  %v2032_v8 = vmul.f32 0.2, %v2026_v4  ;;  %v2017_v9 = vadd.f32 %v2005_v6, %v1898_v5  ;;  %v5895_v5 = vld [vmem:[%s6913_s3 + $0xe0] sm:$0xff]  }
 0x276   : > { %v2040_v10 = vsel %vm6290_vm8, %v2037_v7, 0.0 }
 0x277   : > { %v4866_v12 = vpack.c.bf16 %v2040_v10, %v2040_v10  ;;  %v2035_v13 = vsel %vm2029_vm13, %v2026_v4, %v2032_v8  ;;  %v2027_v14 = vadd.f32 %v4678_v51, %v2017_v9  ;;  %v5894_v4 = vld [vmem:[%s6913_s3 + $0xb0] sm:$0xff]   ;;  %v5896_v8 = vld [vmem:[%s6913_s3 + $0xa8] sm:$0xff]   ;;  %v5897_v9 = vld [vmem:[%s6913_s3 + $0xd8] sm:$0xff]  }
 0x278   : > { %v2038_v16 = vsel %vm6294_vm10, %v2035_v13, 0.0  ;;  %v5899_v10 = vld [vmem:[%s6913_s3 + $0xd0] sm:$0xff]  }
 0x279   : > { %v2056_v19 = vrot.slane %v4866_v12, 6  ;;  %v4864_v20 = vpack.c.bf16 %v2038_v16, %v2038_v16  ;;  %vm2030_vm15 = vcmp.ge.f32.partialorder %v2027_v14, 0.0  ;;  %v2033_v17 = vmul.f32 0.2, %v2027_v14 }
 0x27b   : > { %v2058_v21 = vrot.slane %v2056_v19, 4  ;;  %v2051_v22 = vrot.slane %v4864_v20, 6  ;;  %v2036_v25 = vsel %vm2030_vm15, %v2027_v14, %v2033_v17  ;;  %v5900_v14 = vld [vmem:[%s6913_s3 + $0x98] sm:$0xff]  }
 0x27c   : > { %v2039_v26 = vsel %vm6302_vm14, %v2036_v25, 0.0  ;;  %v5903_v25 = vld [vmem:[%s6913_s3 + $0xc0] sm:$0xff]  }
 0x27d   : > { %2066 = vst [vmem:[#allocation2 + $0xc] sm:$0x3] %v2058_v21  ;;  %2063 = vst [vmem:[#allocation2] sm:$0xc] %v2051_v22  ;;  %v4865_v27 = vpack.c.bf16 %v2039_v26, %v2039_v26  ;;  %v2052_v29 = vrot.slane %v2051_v22, 4  ;;  %v5902_v22 = vld [vmem:[%s6913_s3 + $0x90] sm:$0xff]  }
 0x27f   : > { %v2053_v30 = vrot.slane %v4865_v27, 6 }
 0x281   : > { %v2054_v23 = vsel %vm6308_vm5, %v2052_v29, %v2053_v30  ;;  %v2055_v31 = vrot.slane %v2053_v30, 4 }
 0x282   : > { %2064 = vst [vmem:[#allocation2 + $0x4] sm:$0xf] %v2054_v23  ;;  %v5904_v23 = vld [vmem:[%s6913_s3 + $0x88] sm:$0xff]  }
 0x283   : > { %v2057_v32 = vsel %vm6308_vm5, %v2055_v31, %v2056_v19  ;;  %v5901_v19 = vld [vmem:[%s6913_s3 + $0xc8] sm:$0xff]   ;;  %v5905_v31 = vld [vmem:[%s6913_s3 + $0x178] sm:$0xff]  }
 0x284   : > { %2065 = vst [vmem:[#allocation2 + $0x8] sm:$0xf] %v2057_v32  ;;  %v2086_v33 = vld [vmem:[#allocation2] sm:$0xf]  ;;  %v2089_v39 = vld [vmem:[#allocation2 + $0xc] sm:$0x1] }
 0x285   : > { %v2335_v34 = vld [vmem:[#allocation2] sm:$0xe]  ;;  %v2459_v50 = vld [vmem:[#allocation2 + $0xc] sm:$0x3] }
 0x286   : > { %v2721_v12 = vld [vmem:[#allocation2 + $0xc] sm:$0x7]  ;;  %v2597_v16 = vld [vmem:[#allocation2] sm:$0xc] }
 0x289   : > { %v5883_v36 = vld [vmem:[#allocation2] sm:$0xff]  }
 0x28a   : > { %v6606_v37 = vld [vmem:[#allocation2 + $0x4] sm:$0xf]  ;;  %5424 = vmatprep.mubr.bf16.mxu0 %v5883_v36 }
 0x28b   : > { %v4682_v40 = vcombine.low %v2086_v33, %v6606_v37  ;;  %v4702_v41 = vcombine.low %v2335_v34, %v6606_v37  ;;  %v5885_v42 = vld [vmem:[#allocation2 + $0x8] ss:$0 sps:$4 sm:$0xff]   ;;  %v4720_v20 = vcombine.low %v2597_v16, %v6606_v37 }
 0x28c   : > { %v6613_v43 = vld [vmem:[#allocation2 + $0x8] sm:$0xf]  ;;  %5425 = vmatmul.mubr.bf16.vlgmr.msra.gmra.mxu0 %v5885_v42 }
 0x28d   : > { %v6616_v45 = vcombine.low %v6613_v43, %v2089_v39  ;;  %v2119_v44 = vshll.u32 %v4682_v40, 16  ;;  %v6619_v46 = vcombine.low %v6613_v43, %v2459_v50  ;;  %v2480_v47 = vshrl.u32 %v4702_v41, 16  ;;  %5449 = vmatpush3.bf16.msra.mxu0 %v6581_v24  ;;  %v5909_v39 = vld [vmem:[%s6913_s3 + $0x170] sm:$0xff]   ;;  %v5911_v42 = vld [vmem:[%s6913_s3 + $0x168] sm:$0xff]  }
 0x28e   : > { %v2483_v48 = vshll.u32 %v4702_v41, 16  ;;  %v2117_v49 = vshrl.u32 %v4682_v40, 16  ;;  %5450 = vmatprep.subr.bf16.mxu0 %v5887_v38  ;;  %v2355_v2 = vrot.slane %v4702_v41, 1  ;;  %v6655_v13 = vcombine.low %v6613_v43, %v2721_v12  ;;  %v5910_v41 = vld [vmem:[%s6913_s3 + $0x138] sm:$0xff]  }
 0x28f   : > { %v2121_v52 = vrot.slane %v2119_v44, 1  ;;  %v2124_v53 = vshll.u32 %v6616_v45, 16  ;;  %v2482_v56 = vrot.slane %v2480_v47, 1  ;;  %v2488_v58 = vshrl.u32 %v6619_v46, 16  ;;  %v5912_v47 = vld [vmem:[%s6913_s3 + $0x130] sm:$0xff]   ;;  %v5928_v12 = vld [vmem:[%s6913_s3 + $0x1b8] sm:$0xff]  }
 0x290   : > { %v2485_v57 = vrot.slane %v2483_v48, 2  ;;  %v2491_v59 = vshll.u32 %v6619_v46, 16  ;;  %v2128_v62 = vshrl.u32 %v6616_v45, 16  ;;  %v2356_v24 = vrot.slane %v6616_v45, 1  ;;  %v5913_v48 = vld [vmem:[%s6913_s3 + $0x160] sm:$0xff]  }
 0x291   : > { %v2122_v51 = vor.u32 %v2121_v52, %v2117_v49  ;;  %v2126_v60 = vrot.slane %v2124_v53, 1  ;;  %v2490_v63 = vrot.slane %v2488_v58, 1  ;;  %5451 = vmatpush3.bf16.msra.mxu0 %v5887_v38  ;;  %v2750_v17 = vshrl.u32 %v6655_v13, 16  ;;  %v5908_v38 = vld [vmem:[%s6913_s3 + $0x80] sm:$0xff]   ;;  %v5914_v52 = vld [vmem:[%s6913_s3 + $0x128] sm:$0xff]   ;;  %v5915_v53 = vld [vmem:[%s6913_s3 + $0x158] sm:$0xff]  }
 0x292   : > { %v2493_v61 = vrot.slane %v2491_v59, 2  ;;  %5452 = vmatprep.subr.bf16.mxu0 %v5892_v55  ;;  %v2486_v3 = vor.u32 %v2485_v57, %v2482_v56  ;;  %v2357_v6 = vsel %vm1130_vm6, %v2355_v2, %v2356_v24  ;;  %v2753_v21 = vshll.u32 %v6655_v13, 16  ;;  %v5916_v45 = vld [vmem:[%s6913_s3 + $0x120] sm:$0xff]   ;;  %v6718_v56 = vld [vmem:[#allocation2 + $0xc] sm:$0xf]  ;;  %v5918_v58 = vld [vmem:[%s6913_s3 + $0x118] sm:$0xff]  }
 0x293   : > { %v2127_v0 = vsel %vm428_vm0, %v2122_v51, %v2126_v60  ;;  %v2130_v1 = vor.u32 %v2128_v62, %v2126_v60  ;;  %v2742_v26 = vshrl.u32 %v4720_v20, 16  ;;  %v2745_v27 = vshll.u32 %v4720_v20, 16  ;;  %v2859_v59 = vld [vmem:[#allocation2] sm:$0x8]  ;;  %v5919_v51 = vld [vmem:[%s6913_s3 + $0x148] sm:$0xff]  }
 0x294   : > { %5404 = vmatprep.mubr.bf16.mxu1 %v2127_v0  ;;  %v2494_v15 = vor.u32 %v2493_v61, %v2490_v63  ;;  %v2752_v29 = vrot.slane %v2750_v17, 2  ;;  %v2755_v30 = vrot.slane %v2753_v21, 3  ;;  %v2618_v44 = vrot.slane %v6619_v46, 2  ;;  %v5920_v63 = vld [vmem:[%s6913_s3 + $0x110] sm:$0xff]   ;;  %v5921_v61 = vld [vmem:[%s6913_s3 + $0x140] sm:$0xff]  }
 0x295   : > { %5405 = vmatmul.mubr.bf16.vlgmr.msra.gmra.mxu1 %v2130_v1  ;;  %5453 = vmatpush3.bf16.msra.mxu0 %v5892_v55  ;;  %v2744_v32 = vrot.slane %v2742_v26, 2  ;;  %v2747_v33 = vrot.slane %v2745_v27, 3  ;;  %v2617_v50 = vrot.slane %v4720_v20, 2  ;;  %v5917_v55 = vld [vmem:[%s6913_s3 + $0x150] sm:$0xff]   ;;  %v4747_v57 = vcombine.low %v6613_v43, %v6718_v56  ;;  %v5931_v17 = vld [vmem:[%s6913_s3 + $0x1e0] sm:$0xff]   ;;  %v5936_v26 = vld [vmem:[%s6913_s3 + $0x198] sm:$0xff]  }
 0x296   : > { %5429 = vmatpush3.bf16.msra.mxu1 %v6590_v54  ;;  %5444 = vmatprep.mubr.bf16.mxu1 %v2357_v6  ;;  %v2495_v7 = vsel %vm607_vm2, %v2486_v3, %v2494_v15  ;;  %v5898_v54 = vld [vmem:[%s6913_s3 + $0xa0] sm:$0xff]   ;;  %v6678_v34 = vor.u32 %v2755_v30, %v2752_v29  ;;  %v4738_v60 = vcombine.low %v2859_v59, %v6606_v37  ;;  %v2880_v16 = vrot.slane %v6655_v13, 3  ;;  %v5930_v20 = vld [vmem:[%s6913_s3 + $0x1b0] sm:$0xff]   ;;  %v5932_v13 = vld [vmem:[%s6913_s3 + $0x1a8] sm:$0xff]  }
 0x297   : > { %5464 = vmatprep.mubr.bf16.mxu0 %v2495_v7  ;;  %5430 = vmatprep.subr.bf16.mxu1 %v5894_v4  ;;  %v2748_v36 = vor.u32 %v2747_v33, %v2744_v32  ;;  %v2619_v49 = vsel %vm712_vm3, %v2617_v50, %v2618_v44  ;;  %v3012_v62 = vshrl.u32 %v4747_v57, 16  ;;  %v5934_v46 = vld [vmem:[%s6913_s3 + $0x1a0] sm:$0xff]   ;;  %v5937_v27 = vld [vmem:[%s6913_s3 + $0x1c8] sm:$0xff]   ;;  %v5938_v29 = vld [vmem:[%s6913_s3 + $0x190] sm:$0xff]  }
 0x298   : > { %5454 = vmatprep.subr.bf16.mxu0 %v5895_v5  ;;  %v3004_v0 = vshrl.u32 %v4738_v60, 16  ;;  %v3007_v1 = vshll.u32 %v4738_v60, 16  ;;  %v5939_v30 = vld [vmem:[%s6913_s3 + $0x1c0] sm:$0xff]   ;;  %v5942_v32 = vld [vmem:[%s6913_s3 + $0x238] sm:$0xff]   ;;  %v5944_v33 = vld [vmem:[%s6913_s3 + $0x230] sm:$0xff]  }
 0x299   : > { %5455 = vmatpush3.bf16.msra.mxu0 %v5895_v5  ;;  %v2757_v40 = vsel %vm1517_vm7, %v2748_v36, %v6678_v34  ;;  %v3014_v2 = vrot.slane %v3012_v62, 3  ;;  %v5945_v36 = vld [vmem:[%s6913_s3 + $0x228] sm:$0xff]   ;;  %v5953_v59 = vld [vmem:[#allocation3 + $0x30] sm:$0xff]   ;;  %v5957_v62 = vld [vmem:[#allocation3 + $0x20] sm:$0xff]  }
 0x29a   : > { %5431 = vmatpush3.bf16.msra.mxu1 %v5894_v4  ;;  %5456 = vmatprep.subr.bf16.mxu0 %v5897_v9  ;;  %v5923_v4 = vld [vmem:[%s6913_s3 + $0x1f8] sm:$0xff]   ;;  %v3006_v5 = vrot.slane %v3004_v0, 3  ;;  %v3009_v6 = vrot.slane %v3007_v1, 4  ;;  %v5961_v0 = vld [vmem:[#allocation3 + $0x10] sm:$0xff]  }
 0x29b   : > { %5432 = vmatprep.subr.bf16.mxu1 %v5896_v8 }
 0x29d   : > { %5457 = vmatpush3.bf16.msra.mxu0 %v5897_v9  ;;  %v5926_v9 = vld [vmem:[%s6913_s3 + $0x100] sm:$0xff]  }
 0x29e   : > { %5433 = vmatpush3.bf16.msra.mxu1 %v5896_v8  ;;  %5458 = vmatprep.subr.bf16.mxu0 %v5899_v10  ;;  %v3010_v8 = vor.u32 %v3009_v6, %v3006_v5  ;;  %v5964_v5 = vld [vmem:[#allocation3 + $0x50] sm:$0xff]   ;;  %v5965_v6 = vld [vmem:[#allocation3] sm:$0xff]  }
 0x29f   : > { %5434 = vmatprep.subr.bf16.mxu1 %v5898_v54 }
 0x2a1   : > { %5459 = vmatpush3.bf16.msra.mxu0 %v5899_v10 }
 0x2a2   : > { %5435 = vmatpush3.bf16.msra.mxu1 %v5898_v54  ;;  %5460 = vmatprep.subr.bf16.mxu0 %v5901_v19  ;;  %v5927_v54 = vld [vmem:[%s6913_s3 + $0x1f0] sm:$0xff]  }
 0x2a3   : > { %5436 = vmatprep.subr.bf16.mxu1 %v5900_v14 }
 0x2a5   : > { %5461 = vmatpush3.bf16.msra.mxu0 %v5901_v19  ;;  %v2879_v19 = vrot.slane %v4738_v60, 3  ;;  %v5956_v60 = vld [vmem:[#allocation3 + $0x70] sm:$0xff]  }
 0x2a6   : > { %5437 = vmatpush3.bf16.msra.mxu1 %v5900_v14  ;;  %5462 = vmatprep.subr.bf16.mxu0 %v5903_v25  ;;  %v5929_v14 = vld [vmem:[%s6913_s3 + $0x1e8] sm:$0xff]  }
 0x2a7   : > { %5438 = vmatprep.subr.bf16.mxu1 %v5902_v22  ;;  %v2881_v21 = vsel %vm1656_vm11, %v2879_v19, %v2880_v16 }
 0x2a9   : > { %5463 = vmatpush3.bf16.msra.mxu0 %v5903_v25  ;;  %v5935_v25 = vld [vmem:[%s6913_s3 + $0x1d0] sm:$0xff]  }
 0x2aa   : > { %5439 = vmatpush3.bf16.msra.mxu1 %v5902_v22  ;;  %5488 = vmatprep.subr.bf16.mxu0 %v5905_v31  ;;  %v5933_v22 = vld [vmem:[%s6913_s3 + $0x1d8] sm:$0xff]  }
 0x2ab   : > { %5440 = vmatprep.subr.bf16.mxu1 %v5904_v23 }
 0x2ac   : > { %5465 = vmatmul.mubr.bf16.vlgmr.msra.gmra.mxu0 %v2494_v15  ;;  %v5922_v15 = vld [vmem:[%s6913_s3 + $0x108] sm:$0xff]  }
 0x2ad   : > { %5489 = vmatpush3.bf16.msra.mxu0 %v5905_v31  ;;  %5504 = vmatprep.mubr.bf16.mxu0 %v2757_v40  ;;  %v5941_v31 = vld [vmem:[%s6913_s3 + $0x180] sm:$0xff]  }
 0x2ae   : > { %5441 = vmatpush3.bf16.msra.mxu1 %v5904_v23  ;;  %5490 = vmatprep.subr.bf16.mxu0 %v5909_v39  ;;  %v5940_v23 = vld [vmem:[%s6913_s3 + $0x188] sm:$0xff]   ;;  %v5950_v40 = vld [vmem:[%s6913_s3 + $0x200] sm:$0xff]  }
 0x2af   : > { %5442 = vmatprep.subr.bf16.mxu1 %v5908_v38 }
 0x2b1   : > { %5491 = vmatpush3.bf16.msra.mxu0 %v5909_v39  ;;  %v5949_v39 = vld [vmem:[%s6913_s3 + $0x208] sm:$0xff]  }
 0x2b2   : > { %5443 = vmatpush3.bf16.msra.mxu1 %v5908_v38  ;;  %5492 = vmatprep.subr.bf16.mxu0 %v5911_v42  ;;  %v5946_v38 = vld [vmem:[%s6913_s3 + $0x220] sm:$0xff]  }
 0x2b3   : > { %5468 = vmatprep.subr.bf16.mxu1 %v5910_v41 }
 0x2b5   : > { %5445 = vmatmul.mubr.bf16.vlgmr.msra.gmra.mxu1 %v2356_v24  ;;  %5493 = vmatpush3.bf16.msra.mxu0 %v5911_v42  ;;  %v3015_v24 = vshll.u32 %v4747_v57, 16  ;;  %v5952_v42 = vld [vmem:[#allocation3 + $0x38] sm:$0xff]  }
 0x2b6   : > { %5469 = vmatpush3.bf16.msra.mxu1 %v5910_v41  ;;  %5484 = vmatprep.mubr.bf16.mxu1 %v2619_v49  ;;  %v4757_v41 = vcombine.low %v6718_v56, %v6718_v56  ;;  %v5955_v56 = vld [vmem:[#allocation3 + $0x28] sm:$0xff]  }
 0x2b7   : > { %5470 = vmatprep.subr.bf16.mxu1 %v5912_v47  ;;  %5494 = vmatprep.subr.bf16.mxu0 %v5913_v48  ;;  %v3017_v3 = vrot.slane %v3015_v24, 4  ;;  %v5958_v24 = vld [vmem:[#allocation3 + $0x68] sm:$0xff]  }
 0x2b9   : > { %5495 = vmatpush3.bf16.msra.mxu0 %v5913_v48  ;;  %v3018_v7 = vor.u32 %v3017_v3, %v3014_v2  ;;  %v5962_v2 = vld [vmem:[#allocation3 + $0x58] sm:$0xff]  }
 0x2ba   : > { %5471 = vmatpush3.bf16.msra.mxu1 %v5912_v47  ;;  %5496 = vmatprep.subr.bf16.mxu0 %v5915_v53 }
 0x2bb   : > { %5472 = vmatprep.subr.bf16.mxu1 %v5914_v52  ;;  %v3019_v10 = vsel %vm1781_vm9, %v3010_v8, %v3018_v7 }
 0x2bd   : > { %5497 = vmatpush3.bf16.msra.mxu0 %v5915_v53 }
 0x2be   : > { %5473 = vmatpush3.bf16.msra.mxu1 %v5914_v52  ;;  %5498 = vmatprep.subr.bf16.mxu0 %v5917_v55 }
 0x2bf   : > { %5474 = vmatprep.subr.bf16.mxu1 %v5916_v45 }
 0x2c1   : > { %5499 = vmatpush3.bf16.msra.mxu0 %v5917_v55 }
 0x2c2   : > { %5475 = vmatpush3.bf16.msra.mxu1 %v5916_v45  ;;  %5500 = vmatprep.subr.bf16.mxu0 %v5919_v51 }
 0x2c3   : > { %5476 = vmatprep.subr.bf16.mxu1 %v5918_v58 }
 0x2c5   : > { %5501 = vmatpush3.bf16.msra.mxu0 %v5919_v51  ;;  %v5954_v51 = vld [vmem:[#allocation3 + $0x78] sm:$0xff]  }
 0x2c6   : > { %5477 = vmatpush3.bf16.msra.mxu1 %v5918_v58  ;;  %5502 = vmatprep.subr.bf16.mxu0 %v5921_v61 }
 0x2c7   : > { %5478 = vmatprep.subr.bf16.mxu1 %v5920_v63 }
 0x2c9   : > { %5503 = vmatpush3.bf16.msra.mxu0 %v5921_v61  ;;  %v5960_v61 = vld [vmem:[#allocation3 + $0x60] sm:$0xff]  }
 0x2ca   : > { %5479 = vmatpush3.bf16.msra.mxu1 %v5920_v63  ;;  %5528 = vmatprep.subr.bf16.mxu0 %v5923_v4  ;;  %v5959_v63 = vld [vmem:[#allocation3 + $0x18] sm:$0xff]  }
 0x2cb   : > { %5480 = vmatprep.subr.bf16.mxu1 %v5922_v15 }
 0x2cc   : > { %5505 = vmatmul.mubr.bf16.vlgmr.msra.gmra.mxu0 %v6678_v34  ;;  %v4756_v34 = vcombine.low %v6606_v37, %v6613_v43  ;;  %v5947_v37 = vld [vmem:[%s6913_s3 + $0x218] sm:$0xff]   ;;  %v5948_v43 = vld [vmem:[%s6913_s3 + $0x210] sm:$0xff]  }
 0x2cd   : > { %5529 = vmatpush3.bf16.msra.mxu0 %v5923_v4  ;;  %5544 = vmatprep.mubr.bf16.mxu0 %v3019_v10 }
 0x2ce   : > { %5481 = vmatpush3.bf16.msra.mxu1 %v5922_v15  ;;  %5530 = vmatprep.subr.bf16.mxu0 %v5927_v54  ;;  %v5963_v15 = vld [vmem:[#allocation3 + $0x8] sm:$0xff]  }
 0x2cf   : > { %5482 = vmatprep.subr.bf16.mxu1 %v5926_v9 }
 0x2d1   : > { %5531 = vmatpush3.bf16.msra.mxu0 %v5927_v54  ;;  %v5966_v54 = vld [vmem:[#allocation3 + $0x48] sm:$0xff]  }
 0x2d2   : > { %5483 = vmatpush3.bf16.msra.mxu1 %v5926_v9  ;;  %5532 = vmatprep.subr.bf16.mxu0 %v5929_v14 }
 0x2d3   : > { %5508 = vmatprep.subr.bf16.mxu1 %v5928_v12 }
 0x2d5   : > { %5485 = vmatmul.mubr.bf16.vlgmr.msra.gmra.mxu1 %v2618_v44  ;;  %5533 = vmatpush3.bf16.msra.mxu0 %v5929_v14  ;;  %v6823_v14 = vld [vmem:[#allocation3 + $0xf8] sm:$0xff]  }
 0x2d6   : > { %5509 = vmatpush3.bf16.msra.mxu1 %v5928_v12  ;;  %5524 = vmatprep.mubr.bf16.mxu1 %v2881_v21 }
 0x2d7   : > { %5510 = vmatprep.subr.bf16.mxu1 %v5930_v20  ;;  %5534 = vmatprep.subr.bf16.mxu0 %v5931_v17 }
 0x2d9   : > { %5535 = vmatpush3.bf16.msra.mxu0 %v5931_v17  ;;  %v5970_v17 = vld [vmem:[#allocation3 + $0x40] sm:$0xff]  }
 0x2da   : > { %5511 = vmatpush3.bf16.msra.mxu1 %v5930_v20  ;;  %5536 = vmatprep.subr.bf16.mxu0 %v5933_v22 }
 0x2db   : > { %5512 = vmatprep.subr.bf16.mxu1 %v5932_v13 }
 0x2dd   : > { %5537 = vmatpush3.bf16.msra.mxu0 %v5933_v22 }
 0x2de   : > { %5513 = vmatpush3.bf16.msra.mxu1 %v5932_v13  ;;  %5538 = vmatprep.subr.bf16.mxu0 %v5935_v25 }
 0x2df   : > { %5514 = vmatprep.subr.bf16.mxu1 %v5934_v46 }
 0x2e1   : > { %5539 = vmatpush3.bf16.msra.mxu0 %v5935_v25 }
 0x2e2   : > { %5515 = vmatpush3.bf16.msra.mxu1 %v5934_v46  ;;  %5540 = vmatprep.subr.bf16.mxu0 %v5937_v27  ;;  %v6826_v46 = vld [vmem:[#allocation3 + $0xb8] sm:$0xff]  }
 0x2e3   : > { %5516 = vmatprep.subr.bf16.mxu1 %v5936_v26 }
 0x2e5   : > { %5541 = vmatpush3.bf16.msra.mxu0 %v5937_v27 }
 0x2e6   : > { %5517 = vmatpush3.bf16.msra.mxu1 %v5936_v26  ;;  %5542 = vmatprep.subr.bf16.mxu0 %v5939_v30 }
 0x2e7   : > { %5518 = vmatprep.subr.bf16.mxu1 %v5938_v29 }
 0x2e9   : > { %5543 = vmatpush3.bf16.msra.mxu0 %v5939_v30 }
 0x2ea   : > { %5519 = vmatpush3.bf16.msra.mxu1 %v5938_v29  ;;  %5568 = vmatprep.subr.bf16.mxu0 %v5954_v51 }
 0x2eb   : > { %5520 = vmatprep.subr.bf16.mxu1 %v5940_v23 }
 0x2ec   : > { %5545 = vmatmul.mubr.bf16.vlgmr.msra.gmra.mxu0 %v3018_v7 }
 0x2ed   : > { %5569 = vmatpush3.bf16.msra.mxu0 %v5954_v51 }
 0x2ee   : > { %5521 = vmatpush3.bf16.msra.mxu1 %v5940_v23  ;;  %5570 = vmatprep.subr.bf16.mxu0 %v5956_v60 }
 0x2ef   : > { %5522 = vmatprep.subr.bf16.mxu1 %v5941_v31 }
 0x2f1   : > { %5571 = vmatpush3.bf16.msra.mxu0 %v5956_v60 }
 0x2f2   : > { %5523 = vmatpush3.bf16.msra.mxu1 %v5941_v31  ;;  %5572 = vmatprep.subr.bf16.mxu0 %v5958_v24 }
 0x2f3   : > { %5548 = vmatprep.subr.bf16.mxu1 %v5942_v32 }
 0x2f5   : > { %5525 = vmatmul.mubr.bf16.vlgmr.msra.gmra.mxu1 %v2880_v16  ;;  %5573 = vmatpush3.bf16.msra.mxu0 %v5958_v24 }
 0x2f6   : > { %5549 = vmatpush3.bf16.msra.mxu1 %v5942_v32  ;;  %5564 = vmatprep.mubr.bf16.mxu1 %v4756_v34 }
 0x2f7   : > { %5550 = vmatprep.subr.bf16.mxu1 %v5944_v33  ;;  %5574 = vmatprep.subr.bf16.mxu0 %v5960_v61 }
 0x2f9   : > { %5575 = vmatpush3.bf16.msra.mxu0 %v5960_v61 }
 0x2fa   : > { %5551 = vmatpush3.bf16.msra.mxu1 %v5944_v33  ;;  %5576 = vmatprep.subr.bf16.mxu0 %v5962_v2 }
 0x2fb   : > { %5552 = vmatprep.subr.bf16.mxu1 %v5945_v36 }
 0x2fd   : > { %5577 = vmatpush3.bf16.msra.mxu0 %v5962_v2 }
 0x2fe   : > { %5553 = vmatpush3.bf16.msra.mxu1 %v5945_v36  ;;  %5578 = vmatprep.subr.bf16.mxu0 %v5964_v5 }
 0x2ff   : > { %5554 = vmatprep.subr.bf16.mxu1 %v5946_v38 }
 0x301   : > { %5579 = vmatpush3.bf16.msra.mxu0 %v5964_v5 }
 0x302   : > { %5555 = vmatpush3.bf16.msra.mxu1 %v5946_v38  ;;  %5580 = vmatprep.subr.bf16.mxu0 %v5966_v54 }
 0x303   : > { %5556 = vmatprep.subr.bf16.mxu1 %v5947_v37 }
 0x305   : > { %5581 = vmatpush3.bf16.msra.mxu0 %v5966_v54 }
 0x306   : > { %5557 = vmatpush3.bf16.msra.mxu1 %v5947_v37  ;;  %5582 = vmatprep.subr.bf16.mxu0 %v5970_v17 }
 0x307   : > { %5558 = vmatprep.subr.bf16.mxu1 %v5948_v43 }
 0x309   : > { %5583 = vmatpush3.bf16.msra.mxu0 %v5970_v17 }
 0x30a   : > { %5559 = vmatpush3.bf16.msra.mxu1 %v5948_v43  ;;  %5608 = vmatprep.subr.bf16.mxu0 %v6826_v46 }
 0x30b   : > { %5560 = vmatprep.subr.bf16.mxu1 %v5949_v39 }
 0x30e   : > { %5561 = vmatpush3.bf16.msra.mxu1 %v5949_v39 }
 0x30f   : > { %5562 = vmatprep.subr.bf16.mxu1 %v5950_v40 }
 0x312   : > { %5563 = vmatpush3.bf16.msra.mxu1 %v5950_v40 }
 0x313   : > { %5588 = vmatprep.subr.bf16.mxu1 %v5952_v42 }
 0x315   : > { %5565 = vmatmul.mubr.bf16.vlgmr.msra.gmra.mxu1 %v4757_v41 }
 0x316   : > { %5589 = vmatpush3.bf16.msra.mxu1 %v5952_v42 }
 0x317   : > { %5590 = vmatprep.subr.bf16.mxu1 %v5953_v59 }
 0x31a   : > { %5591 = vmatpush3.bf16.msra.mxu1 %v5953_v59 }
 0x31b   : > { %5592 = vmatprep.subr.bf16.mxu1 %v5955_v56 }
 0x31e   : > { %5593 = vmatpush3.bf16.msra.mxu1 %v5955_v56 }
 0x31f   : > { %5594 = vmatprep.subr.bf16.mxu1 %v5957_v62 }
 0x322   : > { %5595 = vmatpush3.bf16.msra.mxu1 %v5957_v62 }
 0x323   : > { %5596 = vmatprep.subr.bf16.mxu1 %v5959_v63 }
 0x326   : > { %5597 = vmatpush3.bf16.msra.mxu1 %v5959_v63 }
 0x327   : > { %5598 = vmatprep.subr.bf16.mxu1 %v5961_v0 }
 0x32a   : > { %5599 = vmatpush3.bf16.msra.mxu1 %v5961_v0 }
 0x32b   : > { %5600 = vmatprep.subr.bf16.mxu1 %v5963_v15 }
 0x32e   : > { %5601 = vmatpush3.bf16.msra.mxu1 %v5963_v15 }
 0x32f   : > { %5602 = vmatprep.subr.bf16.mxu1 %v5965_v6 }
 0x332   : > { %5603 = vmatpush3.bf16.msra.mxu1 %v5965_v6 }
 0x333   : > { %5628 = vmatprep.subr.bf16.mxu1 %v6823_v14 }
 0x34c   : > { %v5426_v44 = vpop.f32.mrf.mxu0 }
 0x34e   : > { %v2321_v50 = vpop.f32.mrf.mxu0 }
 0x350   : > { %v5427_v47 = vpop.f32.mrf.mxu0 }
 0x352   : > { %v2324_v55 = vpop.f32.mrf.mxu0 }
 0x355   : > { %v5406_v48 = vpop.f32.mrf.mxu1 }
 0x356   : > { %v2330_v49 = vadd.f32 %v5426_v44, %v5406_v48 }
 0x357   : > { %v2215_v52 = vpop.f32.mrf.mxu1 }
 0x358   : > { %v2322_v53 = vadd.f32 %v2321_v50, %v2215_v52 }
 0x359   : > { %v5407_v45 = vpop.f32.mrf.mxu1 }
 0x35a   : > { %v4766_v45 = vld [vmem:[%s6917_s7] ss:$0 sm:$0xff] }
 0x35b   : > { %v2218_v57 = vpop.f32.mrf.mxu1 }
 0x35c   : > { %v2325_v58 = vadd.f32 %v2324_v55, %v2218_v57 }
 0x36c   : > { %v5466_v1 = vpop.f32.mrf.mxu0 }
 0x36e   : > { %v2580_v3 = vpop.f32.mrf.mxu0 }
 0x370   : > { %v5467_v4 = vpop.f32.mrf.mxu0 }
 0x372   : > { %v2583_v13 = vpop.f32.mrf.mxu0 }
 0x375   : > { %v5446_v7 = vpop.f32.mrf.mxu1 }
 0x376   : > { %v2458_v8 = vadd.f32 %v5446_v7, %v2330_v49 }
 0x377   : > { %v2442_v9 = vpop.f32.mrf.mxu1 }
 0x378   : > { %v2456_v10 = vadd.f32 %v2442_v9, %v2322_v53  ;;  %v2596_v12 = vadd.f32 %v5466_v1, %v2458_v8 }
 0x379   : > { %v5447_v16 = vpop.f32.mrf.mxu1 }
 0x37a   : > { %v2594_v19 = vadd.f32 %v2580_v3, %v2456_v10 }
 0x37b   : > { %v2445_v20 = vpop.f32.mrf.mxu1 }
 0x37c   : > { %v2457_v21 = vadd.f32 %v2445_v20, %v2325_v58 }
 0x37e   : > { %v2595_v22 = vadd.f32 %v2583_v13, %v2457_v21 }
 0x38c   : > { %v5506_v25 = vpop.f32.mrf.mxu0 }
 0x38e   : > { %v2842_v26 = vpop.f32.mrf.mxu0 }
 0x390   : > { %v5507_v27 = vpop.f32.mrf.mxu0 }
 0x392   : > { %v2845_v36 = vpop.f32.mrf.mxu0 }
 0x395   : > { %v5486_v29 = vpop.f32.mrf.mxu1 }
 0x396   : > { %v2720_v30 = vadd.f32 %v5486_v29, %v2596_v12 }
 0x397   : > { %v2704_v23 = vpop.f32.mrf.mxu1 }
 0x398   : > { %v2718_v31 = vadd.f32 %v2704_v23, %v2594_v19  ;;  %v2858_v32 = vadd.f32 %v5506_v25, %v2720_v30 }
 0x399   : > { %v5487_v33 = vpop.f32.mrf.mxu1 }
 0x39a   : > { %v2856_v34 = vadd.f32 %v2842_v26, %v2718_v31 }
 0x39b   : > { %v2707_v39 = vpop.f32.mrf.mxu1 }
 0x39c   : > { %v2719_v44 = vadd.f32 %v2707_v39, %v2595_v22 }
 0x39e   : > { %v2857_v49 = vadd.f32 %v2845_v36, %v2719_v44 }
 0x3ac   : > { %v5546_v38 = vpop.f32.mrf.mxu0 }
 0x3ae   : > { %v3104_v37 = vpop.f32.mrf.mxu0 }
 0x3b0   : > { %v5547_v43 = vpop.f32.mrf.mxu0 }
 0x3b2   : > { %v3107_v60 = vpop.f32.mrf.mxu0 }
 0x3b5   : > { %v5526_v40 = vpop.f32.mrf.mxu1 }
 0x3b6   : > { %v2982_v50 = vadd.f32 %v5526_v40, %v2858_v32 }
 0x3b7   : > { %v2966_v41 = vpop.f32.mrf.mxu1 }
 0x3b8   : > { %v2980_v47 = vadd.f32 %v2966_v41, %v2856_v34  ;;  %v3120_v52 = vadd.f32 %v5546_v38, %v2982_v50  ;;  %v5976_v41 = vld [vmem:[#allocation3 + $0xe8] sm:$0xff]  }
 0x3b9   : > { %v5527_v42 = vpop.f32.mrf.mxu1 }
 0x3ba   : > { %v3118_v58 = vadd.f32 %v3104_v37, %v2980_v47 }
 0x3bb   : > { %v2969_v48 = vpop.f32.mrf.mxu1 }
 0x3bc   : > { %v2981_v55 = vadd.f32 %v2969_v48, %v2857_v49 }
 0x3be   : > { %v3119_v61 = vadd.f32 %v3107_v60, %v2981_v55  ;;  %v5979_v60 = vld [vmem:[#allocation3 + $0xe0] sm:$0xff]  }
 0x3d5   : > { %v5566_v53 = vpop.f32.mrf.mxu1 }
 0x3d6   : > { %v3239_v57 = vadd.f32 %v5566_v53, %v3120_v52 }
 0x3d7   : > { %v3223_v59 = vpop.f32.mrf.mxu1 }
 0x3d8   : > { %v3249_v51 = vadd.f32 %v4766_v45, %v3239_v57  ;;  %v3237_v56 = vadd.f32 %v3223_v59, %v3118_v58 }
 0x3d9   : > { %v5567_v62 = vpop.f32.mrf.mxu1 }
 0x3da   : > { %vm3252_vm1 = vcmp.ge.f32.partialorder %v3249_v51, 0.0  ;;  %v3255_v24 = vmul.f32 0.2, %v3249_v51  ;;  %v3247_v63 = vadd.f32 %v4766_v45, %v3237_v56  ;;  %v5978_v56 = vld [vmem:[#allocation3 + $0xb0] sm:$0xff]  }
 0x3db   : > { %v3226_v0 = vpop.f32.mrf.mxu1 }
 0x3dc   : > { %v3258_v1 = vsel %vm3252_vm1, %v3249_v51, %v3255_v24  ;;  %vm3250_vm4 = vcmp.ge.f32.partialorder %v3247_v63, 0.0  ;;  %v3253_v2 = vmul.f32 0.2, %v3247_v63  ;;  %v3238_v3 = vadd.f32 %v3226_v0, %v3119_v61  ;;  %v5981_v61 = vld [vmem:[#allocation3 + $0xd8] sm:$0xff]  }
 0x3dd   : > { %v3261_v15 = vsel %vm6290_vm8, %v3258_v1, 0.0  ;;  %v5982_v1 = vld [vmem:[#allocation3 + $0xa0] sm:$0xff]  }
 0x3de   : > { %v4869_v4 = vpack.c.bf16 %v3261_v15, %v3261_v15  ;;  %v3256_v5 = vsel %vm3250_vm4, %v3247_v63, %v3253_v2  ;;  %v3248_v6 = vadd.f32 %v4766_v45, %v3238_v3  ;;  %v5980_v63 = vld [vmem:[#allocation3 + $0xa8] sm:$0xff]   ;;  %v5983_v2 = vld [vmem:[#allocation3 + $0xd0] sm:$0xff]   ;;  %v5984_v15 = vld [vmem:[#allocation3 + $0x98] sm:$0xff]  }
 0x3df   : > { %v3259_v7 = vsel %vm6294_vm10, %v3256_v5, 0.0  ;;  %v5985_v5 = vld [vmem:[#allocation3 + $0xc8] sm:$0xff]  }
 0x3e0   : > { %v3277_v8 = vrot.slane %v4869_v4, 6  ;;  %v4867_v9 = vpack.c.bf16 %v3259_v7, %v3259_v7  ;;  %vm3251_vm12 = vcmp.ge.f32.partialorder %v3248_v6, 0.0  ;;  %v3254_v54 = vmul.f32 0.2, %v3248_v6 }
 0x3e2   : > { %v3279_v10 = vrot.slane %v3277_v8, 4  ;;  %v3272_v12 = vrot.slane %v4867_v9, 6  ;;  %v3257_v16 = vsel %vm3251_vm12, %v3248_v6, %v3254_v54  ;;  %v5986_v9 = vld [vmem:[#allocation3 + $0x90] sm:$0xff]   ;;  %v5987_v54 = vld [vmem:[#allocation3 + $0xc0] sm:$0xff]  }
 0x3e3   : > { %v3260_v19 = vsel %vm6302_vm14, %v3257_v16, 0.0 }
 0x3e4   : > { %3287 = vst [vmem:[#allocation2 + $0xc] sm:$0x3] %v3279_v10  ;;  %3284 = vst [vmem:[#allocation2] sm:$0xc] %v3272_v12  ;;  %v4868_v11 = vpack.c.bf16 %v3260_v19, %v3260_v19  ;;  %v3273_v20 = vrot.slane %v3272_v12, 4 }
 0x3e6   : > { %v3274_v17 = vrot.slane %v4868_v11, 6  ;;  %v5988_v11 = vld [vmem:[#allocation3 + $0x88] sm:$0xff]  }
 0x3e8   : > { %v3275_v21 = vsel %vm6308_vm5, %v3273_v20, %v3274_v17  ;;  %v3276_v18 = vrot.slane %v3274_v17, 4  ;;  %v5989_v20 = vld [vmem:[#allocation3 + $0x178] sm:$0xff]  }
 0x3e9   : > { %3285 = vst [vmem:[#allocation2 + $0x4] sm:$0xf] %v3275_v21 }
 0x3ea   : > { %v3278_v13 = vsel %vm6308_vm5, %v3276_v18, %v3277_v8 }
 0x3eb   : > { %3286 = vst [vmem:[#allocation2 + $0x8] sm:$0xf] %v3278_v13  ;;  %v3307_v22 = vld [vmem:[#allocation2] sm:$0xf]  ;;  %v3310_v29 = vld [vmem:[#allocation2 + $0xc] sm:$0x1] }
 0x3ec   : > { %v3556_v25 = vld [vmem:[#allocation2] sm:$0xe]  ;;  %v3680_v34 = vld [vmem:[#allocation2 + $0xc] sm:$0x3] }
 0x3ed   : > { %v3942_v3 = vld [vmem:[#allocation2 + $0xc] sm:$0x7]  ;;  %v3818_v4 = vld [vmem:[#allocation2] sm:$0xc] }
 0x3f0   : > { %v5967_v26 = vld [vmem:[#allocation2] sm:$0xff]  }
 0x3f1   : > { %v6842_v27 = vld [vmem:[#allocation2 + $0x4] sm:$0xf]  ;;  %5604 = vmatprep.mubr.bf16.mxu1 %v5967_v26 }
 0x3f2   : > { %v4770_v30 = vcombine.low %v3307_v22, %v6842_v27  ;;  %v4790_v23 = vcombine.low %v3556_v25, %v6842_v27  ;;  %v5969_v31 = vld [vmem:[#allocation2 + $0x8] ss:$0 sps:$4 sm:$0xff]   ;;  %v4808_v6 = vcombine.low %v3818_v4, %v6842_v27  ;;  %v5992_v22 = vld [vmem:[#allocation3 + $0x80] sm:$0xff]   ;;  %v5993_v25 = vld [vmem:[#allocation3 + $0x170] sm:$0xff]  }
 0x3f3   : > { %v6846_v32 = vld [vmem:[#allocation2 + $0x8] sm:$0xf]  ;;  %5605 = vmatmul.mubr.bf16.vlgmr.msra.gmra.mxu1 %v5969_v31  ;;  %v5996_v31 = vld [vmem:[#allocation3 + $0x130] sm:$0xff]   ;;  %v6015_v4 = vld [vmem:[#allocation3 + $0x1e0] sm:$0xff]  }
 0x3f4   : > { %v6849_v33 = vcombine.low %v6846_v32, %v3310_v29  ;;  %v3340_v35 = vshll.u32 %v4770_v30, 16  ;;  %v6852_v36 = vcombine.low %v6846_v32, %v3680_v34  ;;  %v3701_v38 = vshrl.u32 %v4790_v23, 16  ;;  %5629 = vmatpush3.bf16.msra.mxu1 %v6823_v14  ;;  %v5995_v29 = vld [vmem:[#allocation3 + $0x168] sm:$0xff]  }
 0x3f5   : > { %v3704_v37 = vshll.u32 %v4790_v23, 16  ;;  %v3338_v43 = vshrl.u32 %v4770_v30, 16  ;;  %5630 = vmatprep.subr.bf16.mxu1 %v5971_v28  ;;  %v3576_v58 = vrot.slane %v4790_v23, 1  ;;  %v4844_v0 = vcombine.low %v6842_v27, %v6846_v32 }
 0x3f6   : > { %v3342_v39 = vrot.slane %v3340_v35, 1  ;;  %v3345_v40 = vshll.u32 %v6849_v33, 16  ;;  %v3703_v42 = vrot.slane %v3701_v38, 1  ;;  %v3709_v50 = vshrl.u32 %v6852_v36, 16  ;;  %v5997_v35 = vld [vmem:[#allocation3 + $0x160] sm:$0xff]   ;;  %v5998_v38 = vld [vmem:[#allocation3 + $0x128] sm:$0xff]  }
 0x3f7   : > { %v3706_v44 = vrot.slane %v3704_v37, 2  ;;  %v3712_v47 = vshll.u32 %v6852_v36, 16  ;;  %v3349_v52 = vshrl.u32 %v6849_v33, 16  ;;  %v3577_v53 = vrot.slane %v6849_v33, 1  ;;  %v5999_v37 = vld [vmem:[#allocation3 + $0x158] sm:$0xff]  }
 0x3f8   : > { %v3343_v48 = vor.u32 %v3342_v39, %v3338_v43  ;;  %v3347_v49 = vrot.slane %v3345_v40, 1  ;;  %v3711_v45 = vrot.slane %v3709_v50, 1  ;;  %5631 = vmatpush3.bf16.msra.mxu1 %v5971_v28  ;;  %v3963_v10 = vshrl.u32 %v4808_v6, 16  ;;  %v5994_v28 = vld [vmem:[#allocation3 + $0x138] sm:$0xff]   ;;  %v6000_v43 = vld [vmem:[#allocation3 + $0x120] sm:$0xff]   ;;  %v6001_v39 = vld [vmem:[#allocation3 + $0x150] sm:$0xff]  }
 0x3f9   : > { %v3714_v14 = vrot.slane %v3712_v47, 2  ;;  %5632 = vmatprep.subr.bf16.mxu1 %v5976_v41  ;;  %v3707_v59 = vor.u32 %v3706_v44, %v3703_v42  ;;  %v3578_v62 = vsel %vm1130_vm6, %v3576_v58, %v3577_v53  ;;  %v3966_v12 = vshll.u32 %v4808_v6, 16  ;;  %v6884_v40 = vld [vmem:[#allocation2 + $0xc] sm:$0xf]  ;;  %v4080_v42 = vld [vmem:[#allocation2] sm:$0x8] }
 0x3fa   : > { %v3348_v55 = vsel %vm428_vm0, %v3343_v48, %v3347_v49  ;;  %v3351_v57 = vor.u32 %v3349_v52, %v3347_v49  ;;  %v3965_v17 = vrot.slane %v3963_v10, 2  ;;  %v3839_v30 = vrot.slane %v6852_v36, 2  ;;  %v6003_v44 = vld [vmem:[#allocation3 + $0x148] sm:$0xff]   ;;  %v6004_v49 = vld [vmem:[#allocation3 + $0x110] sm:$0xff]   ;;  %v6005_v52 = vld [vmem:[#allocation3 + $0x140] sm:$0xff]  }
 0x3fb   : > { %5584 = vmatprep.mubr.bf16.mxu0 %v3348_v55  ;;  %v3715_v51 = vor.u32 %v3714_v14, %v3711_v45  ;;  %v3968_v21 = vrot.slane %v3966_v12, 3  ;;  %v3838_v23 = vrot.slane %v4808_v6, 2  ;;  %v4835_v33 = vcombine.low %v6846_v32, %v6884_v40  ;;  %v6007_v58 = vld [vmem:[#allocation3 + $0x1f8] sm:$0xff]   ;;  %v6016_v6 = vld [vmem:[#allocation3 + $0x1a8] sm:$0xff]   ;;  %v6023_v10 = vld [vmem:[#allocation3 + $0x1c0] sm:$0xff]  }
 0x3fc   : > { %5585 = vmatmul.mubr.bf16.vlgmr.msra.gmra.mxu0 %v3351_v57  ;;  %5633 = vmatpush3.bf16.msra.mxu1 %v5976_v41  ;;  %v6002_v41 = vld [vmem:[#allocation3 + $0x118] sm:$0xff]   ;;  %v4826_v50 = vcombine.low %v4080_v42, %v6842_v27  ;;  %v6006_v57 = vld [vmem:[#allocation3 + $0x108] sm:$0xff]   ;;  %v4845_v27 = vcombine.low %v6884_v40, %v6884_v40 }
 0x3fd   : > { %5609 = vmatpush3.bf16.msra.mxu0 %v6826_v46  ;;  %5624 = vmatprep.mubr.bf16.mxu0 %v3578_v62  ;;  %v3716_v24 = vsel %vm607_vm2, %v3707_v59, %v3715_v51  ;;  %v6869_v46 = vcombine.low %v6846_v32, %v3942_v3  ;;  %v3969_v13 = vor.u32 %v3968_v21, %v3965_v17  ;;  %v4233_v47 = vshrl.u32 %v4835_v33, 16  ;;  %v6010_v62 = vld [vmem:[#allocation3 + $0x100] sm:$0xff]   ;;  %v6020_v36 = vld [vmem:[#allocation3 + $0x198] sm:$0xff]   ;;  %v6024_v12 = vld [vmem:[#allocation3 + $0x188] sm:$0xff]  }
 0x3fe   : > { %5644 = vmatprep.mubr.bf16.mxu1 %v3716_v24  ;;  %5610 = vmatprep.subr.bf16.mxu0 %v5978_v56  ;;  %v3840_v34 = vsel %vm712_vm3, %v3838_v23, %v3839_v30  ;;  %v4236_v48 = vshll.u32 %v4835_v33, 16  ;;  %v4228_v45 = vshll.u32 %v4826_v50, 16  ;;  %v6011_v24 = vld [vmem:[#allocation3 + $0x1f0] sm:$0xff]   ;;  %v4100_v3 = vrot.slane %v4826_v50, 3  ;;  %v6030_v17 = vld [vmem:[#allocation3 + $0x220] sm:$0xff]   ;;  %v6031_v21 = vld [vmem:[#allocation3 + $0x218] sm:$0xff]  }
 0x3ff   : > { %5634 = vmatprep.subr.bf16.mxu1 %v5979_v60  ;;  %v3971_v7 = vshrl.u32 %v6869_v46, 16  ;;  %v3974_v8 = vshll.u32 %v6869_v46, 16  ;;  %v4235_v14 = vrot.slane %v4233_v47, 3 }
 0x400   : > { %5635 = vmatpush3.bf16.msra.mxu1 %v5979_v60  ;;  %v4238_v55 = vrot.slane %v4236_v48, 4 }
 0x401   : > { %5611 = vmatpush3.bf16.msra.mxu0 %v5978_v56  ;;  %5636 = vmatprep.subr.bf16.mxu1 %v5981_v61  ;;  %v3973_v16 = vrot.slane %v3971_v7, 2  ;;  %v3976_v19 = vrot.slane %v3974_v8, 3  ;;  %v6017_v7 = vld [vmem:[#allocation3 + $0x1d8] sm:$0xff]   ;;  %v6019_v8 = vld [vmem:[#allocation3 + $0x1d0] sm:$0xff]  }
 0x402   : > { %5612 = vmatprep.subr.bf16.mxu0 %v5980_v63  ;;  %v4239_v56 = vor.u32 %v4238_v55, %v4235_v14 }
 0x403   : > { %v6874_v18 = vor.u32 %v3976_v19, %v3973_v16  ;;  %v6025_v16 = vld [vmem:[#allocation3 + $0x180] sm:$0xff]   ;;  %v6026_v19 = vld [vmem:[#allocation3 + $0x238] sm:$0xff]  }
 0x404   : > { %5637 = vmatpush3.bf16.msra.mxu1 %v5981_v61  ;;  %v6012_v61 = vld [vmem:[#allocation3 + $0x1b8] sm:$0xff]  }
 0x405   : > { %5613 = vmatpush3.bf16.msra.mxu0 %v5980_v63  ;;  %5638 = vmatprep.subr.bf16.mxu1 %v5983_v2  ;;  %v3978_v26 = vsel %vm1517_vm7, %v3969_v13, %v6874_v18  ;;  %v6033_v13 = vld [vmem:[#allocation3 + $0x208] sm:$0xff]  }
 0x406   : > { %5614 = vmatprep.subr.bf16.mxu0 %v5982_v1 }
 0x408   : > { %5639 = vmatpush3.bf16.msra.mxu1 %v5983_v2  ;;  %v4101_v2 = vrot.slane %v6869_v46, 3  ;;  %v6018_v46 = vld [vmem:[#allocation3 + $0x1a0] sm:$0xff]  }
 0x409   : > { %5615 = vmatpush3.bf16.msra.mxu0 %v5982_v1  ;;  %5640 = vmatprep.subr.bf16.mxu1 %v5985_v5  ;;  %v6013_v1 = vld [vmem:[#allocation3 + $0x1e8] sm:$0xff]  }
 0x40a   : > { %5616 = vmatprep.subr.bf16.mxu0 %v5984_v15 }
 0x40c   : > { %5641 = vmatpush3.bf16.msra.mxu1 %v5985_v5  ;;  %v4102_v5 = vsel %vm1656_vm11, %v4100_v3, %v4101_v2 }
 0x40d   : > { %5617 = vmatpush3.bf16.msra.mxu0 %v5984_v15  ;;  %5642 = vmatprep.subr.bf16.mxu1 %v5987_v54  ;;  %v6014_v15 = vld [vmem:[#allocation3 + $0x1b0] sm:$0xff]  }
 0x40e   : > { %5618 = vmatprep.subr.bf16.mxu0 %v5986_v9 }
 0x410   : > { %5643 = vmatpush3.bf16.msra.mxu1 %v5987_v54  ;;  %v6022_v54 = vld [vmem:[#allocation3 + $0x190] sm:$0xff]  }
 0x411   : > { %5619 = vmatpush3.bf16.msra.mxu0 %v5986_v9  ;;  %5668 = vmatprep.subr.bf16.mxu1 %v5989_v20  ;;  %v6021_v9 = vld [vmem:[#allocation3 + $0x1c8] sm:$0xff]  }
 0x412   : > { %5620 = vmatprep.subr.bf16.mxu0 %v5988_v11 }
 0x413   : > { %5645 = vmatmul.mubr.bf16.vlgmr.msra.gmra.mxu1 %v3715_v51  ;;  %v4230_v51 = vrot.slane %v4228_v45, 4 }
 0x414   : > { %5669 = vmatpush3.bf16.msra.mxu1 %v5989_v20  ;;  %5684 = vmatprep.mubr.bf16.mxu1 %v3978_v26  ;;  %v6029_v20 = vld [vmem:[#allocation3 + $0x228] sm:$0xff]  }
 0x415   : > { %5621 = vmatpush3.bf16.msra.mxu0 %v5988_v11  ;;  %5670 = vmatprep.subr.bf16.mxu1 %v5993_v25  ;;  %v6028_v11 = vld [vmem:[#allocation3 + $0x230] sm:$0xff]  }
 0x416   : > { %5622 = vmatprep.subr.bf16.mxu0 %v5992_v22 }
 0x418   : > { %5671 = vmatpush3.bf16.msra.mxu1 %v5993_v25 }
 0x419   : > { %5623 = vmatpush3.bf16.msra.mxu0 %v5992_v22  ;;  %5672 = vmatprep.subr.bf16.mxu1 %v5995_v29  ;;  %v6034_v22 = vld [vmem:[#allocation3 + $0x200] sm:$0xff]  }
 0x41a   : > { %5648 = vmatprep.subr.bf16.mxu0 %v5994_v28 }
 0x41c   : > { %5625 = vmatmul.mubr.bf16.vlgmr.msra.gmra.mxu0 %v3577_v53  ;;  %5673 = vmatpush3.bf16.msra.mxu1 %v5995_v29  ;;  %v4225_v53 = vshrl.u32 %v4826_v50, 16 }
 0x41d   : > { %5649 = vmatpush3.bf16.msra.mxu0 %v5994_v28  ;;  %5664 = vmatprep.mubr.bf16.mxu0 %v3840_v34 }
 0x41e   : > { %5650 = vmatprep.subr.bf16.mxu0 %v5996_v31  ;;  %5674 = vmatprep.subr.bf16.mxu1 %v5997_v35  ;;  %v4227_v59 = vrot.slane %v4225_v53, 3 }
 0x420   : > { %5675 = vmatpush3.bf16.msra.mxu1 %v5997_v35  ;;  %v4231_v60 = vor.u32 %v4230_v51, %v4227_v59 }
 0x421   : > { %5651 = vmatpush3.bf16.msra.mxu0 %v5996_v31  ;;  %5676 = vmatprep.subr.bf16.mxu1 %v5999_v37 }
 0x422   : > { %5652 = vmatprep.subr.bf16.mxu0 %v5998_v38  ;;  %v4240_v63 = vsel %vm1781_vm9, %v4231_v60, %v4239_v56 }
 0x424   : > { %5677 = vmatpush3.bf16.msra.mxu1 %v5999_v37 }
 0x425   : > { %5653 = vmatpush3.bf16.msra.mxu0 %v5998_v38  ;;  %5678 = vmatprep.subr.bf16.mxu1 %v6001_v39 }
 0x426   : > { %5654 = vmatprep.subr.bf16.mxu0 %v6000_v43 }
 0x428   : > { %5679 = vmatpush3.bf16.msra.mxu1 %v6001_v39 }
 0x429   : > { %5655 = vmatpush3.bf16.msra.mxu0 %v6000_v43  ;;  %5680 = vmatprep.subr.bf16.mxu1 %v6003_v44 }
 0x42a   : > { %5656 = vmatprep.subr.bf16.mxu0 %v6002_v41 }
 0x42c   : > { %5681 = vmatpush3.bf16.msra.mxu1 %v6003_v44 }
 0x42d   : > { %5657 = vmatpush3.bf16.msra.mxu0 %v6002_v41  ;;  %5682 = vmatprep.subr.bf16.mxu1 %v6005_v52 }
 0x42e   : > { %5658 = vmatprep.subr.bf16.mxu0 %v6004_v49 }
 0x430   : > { %5683 = vmatpush3.bf16.msra.mxu1 %v6005_v52 }
 0x431   : > { %5659 = vmatpush3.bf16.msra.mxu0 %v6004_v49  ;;  %5708 = vmatprep.subr.bf16.mxu1 %v6007_v58 }
 0x432   : > { %5660 = vmatprep.subr.bf16.mxu0 %v6006_v57 }
 0x433   : > { %5685 = vmatmul.mubr.bf16.vlgmr.msra.gmra.mxu1 %v6874_v18  ;;  %v6032_v18 = vld [vmem:[#allocation3 + $0x210] sm:$0xff]  }
 0x434   : > { %5709 = vmatpush3.bf16.msra.mxu1 %v6007_v58  ;;  %5724 = vmatprep.mubr.bf16.mxu1 %v4240_v63 }
 0x435   : > { %5661 = vmatpush3.bf16.msra.mxu0 %v6006_v57  ;;  %5710 = vmatprep.subr.bf16.mxu1 %v6011_v24 }
 0x436   : > { %5662 = vmatprep.subr.bf16.mxu0 %v6010_v62 }
 0x438   : > { %5711 = vmatpush3.bf16.msra.mxu1 %v6011_v24 }
 0x439   : > { %5663 = vmatpush3.bf16.msra.mxu0 %v6010_v62  ;;  %5712 = vmatprep.subr.bf16.mxu1 %v6013_v1 }
 0x43a   : > { %5688 = vmatprep.subr.bf16.mxu0 %v6012_v61 }
 0x43c   : > { %5665 = vmatmul.mubr.bf16.vlgmr.msra.gmra.mxu0 %v3839_v30  ;;  %5713 = vmatpush3.bf16.msra.mxu1 %v6013_v1 }
 0x43d   : > { %5689 = vmatpush3.bf16.msra.mxu0 %v6012_v61  ;;  %5704 = vmatprep.mubr.bf16.mxu0 %v4102_v5 }
 0x43e   : > { %5690 = vmatprep.subr.bf16.mxu0 %v6014_v15  ;;  %5714 = vmatprep.subr.bf16.mxu1 %v6015_v4 }
 0x440   : > { %5715 = vmatpush3.bf16.msra.mxu1 %v6015_v4 }
 0x441   : > { %5691 = vmatpush3.bf16.msra.mxu0 %v6014_v15  ;;  %5716 = vmatprep.subr.bf16.mxu1 %v6017_v7 }
 0x442   : > { %5692 = vmatprep.subr.bf16.mxu0 %v6016_v6 }
 0x444   : > { %5717 = vmatpush3.bf16.msra.mxu1 %v6017_v7 }
 0x445   : > { %5693 = vmatpush3.bf16.msra.mxu0 %v6016_v6  ;;  %5718 = vmatprep.subr.bf16.mxu1 %v6019_v8 }
 0x446   : > { %5694 = vmatprep.subr.bf16.mxu0 %v6018_v46 }
 0x448   : > { %5719 = vmatpush3.bf16.msra.mxu1 %v6019_v8 }
 0x449   : > { %5695 = vmatpush3.bf16.msra.mxu0 %v6018_v46  ;;  %5720 = vmatprep.subr.bf16.mxu1 %v6021_v9 }
 0x44a   : > { %5696 = vmatprep.subr.bf16.mxu0 %v6020_v36 }
 0x44c   : > { %5721 = vmatpush3.bf16.msra.mxu1 %v6021_v9  ;;  %v4854_v9 = vld [vmem:[%s6918_s8] ss:$0 sm:$0xff] }
 0x44d   : > { %5697 = vmatpush3.bf16.msra.mxu0 %v6020_v36  ;;  %5722 = vmatprep.subr.bf16.mxu1 %v6023_v10 }
 0x44e   : > { %5698 = vmatprep.subr.bf16.mxu0 %v6022_v54 }
 0x450   : > { %5723 = vmatpush3.bf16.msra.mxu1 %v6023_v10 }
 0x451   : > { %5699 = vmatpush3.bf16.msra.mxu0 %v6022_v54 }
 0x452   : > { %5700 = vmatprep.subr.bf16.mxu0 %v6024_v12 }
 0x453   : > { %5725 = vmatmul.mubr.bf16.vlgmr.msra.gmra.mxu1 %v4239_v56 }
 0x455   : > { %5701 = vmatpush3.bf16.msra.mxu0 %v6024_v12 }
 0x456   : > { %5702 = vmatprep.subr.bf16.mxu0 %v6025_v16 }
 0x459   : > { %5703 = vmatpush3.bf16.msra.mxu0 %v6025_v16 }
 0x45a   : > { %5728 = vmatprep.subr.bf16.mxu0 %v6026_v19 }
 0x45c   : > { %5705 = vmatmul.mubr.bf16.vlgmr.msra.gmra.mxu0 %v4101_v2 }
 0x45d   : > { %5729 = vmatpush3.bf16.msra.mxu0 %v6026_v19  ;;  %5744 = vmatprep.mubr.bf16.mxu0 %v4844_v0 }
 0x45e   : > { %5730 = vmatprep.subr.bf16.mxu0 %v6028_v11 }
 0x461   : > { %5731 = vmatpush3.bf16.msra.mxu0 %v6028_v11 }
 0x462   : > { %5732 = vmatprep.subr.bf16.mxu0 %v6029_v20 }
 0x465   : > { %5733 = vmatpush3.bf16.msra.mxu0 %v6029_v20 }
 0x466   : > { %5734 = vmatprep.subr.bf16.mxu0 %v6030_v17 }
 0x469   : > { %5735 = vmatpush3.bf16.msra.mxu0 %v6030_v17 }
 0x46a   : > { %5736 = vmatprep.subr.bf16.mxu0 %v6031_v21 }
 0x46d   : > { %5737 = vmatpush3.bf16.msra.mxu0 %v6031_v21 }
 0x46e   : > { %5738 = vmatprep.subr.bf16.mxu0 %v6032_v18 }
 0x471   : > { %5739 = vmatpush3.bf16.msra.mxu0 %v6032_v18 }
 0x472   : > { %5740 = vmatprep.subr.bf16.mxu0 %v6033_v13 }
 0x475   : > { %5741 = vmatpush3.bf16.msra.mxu0 %v6033_v13 }
 0x476   : > { %5742 = vmatprep.subr.bf16.mxu0 %v6034_v22 }
 0x479   : > { %5743 = vmatpush3.bf16.msra.mxu0 %v6034_v22 }
 0x47c   : > { %5745 = vmatmul.mubr.bf16.vlgmr.msra.gmra.mxu0 %v4845_v27 }
 0x4b3   : > { %v5606_v32 = vpop.f32.mrf.mxu1 }
 0x4b5   : > { %v3542_v0 = vpop.f32.mrf.mxu1 }
 0x4b7   : > { %v5607_v25 = vpop.f32.mrf.mxu1 }
 0x4b9   : > { %v3545_v31 = vpop.f32.mrf.mxu1 }
 0x4bc   : > { %v5586_v26 = vpop.f32.mrf.mxu0 }
 0x4bd   : > { %v3551_v28 = vadd.f32 %v5606_v32, %v5586_v26 }
 0x4be   : > { %v3436_v29 = vpop.f32.mrf.mxu0 }
 0x4bf   : > { %v3543_v30 = vadd.f32 %v3542_v0, %v3436_v29 }
 0x4c0   : > { %v5587_v23 = vpop.f32.mrf.mxu0 }
 0x4c2   : > { %v3439_v35 = vpop.f32.mrf.mxu0 }
 0x4c3   : > { %v3546_v34 = vadd.f32 %v3545_v31, %v3439_v35 }
 0x4d3   : > { %v5646_v38 = vpop.f32.mrf.mxu1 }
 0x4d5   : > { %v3801_v37 = vpop.f32.mrf.mxu1 }
 0x4d7   : > { %v5647_v43 = vpop.f32.mrf.mxu1 }
 0x4d9   : > { %v3804_v49 = vpop.f32.mrf.mxu1 }
 0x4dc   : > { %v5626_v39 = vpop.f32.mrf.mxu0 }
 0x4dd   : > { %v3679_v33 = vadd.f32 %v5626_v39, %v3551_v28 }
 0x4de   : > { %v3663_v41 = vpop.f32.mrf.mxu0 }
 0x4df   : > { %v3677_v42 = vadd.f32 %v3663_v41, %v3543_v30  ;;  %v3817_v40 = vadd.f32 %v5646_v38, %v3679_v33 }
 0x4e0   : > { %v5627_v44 = vpop.f32.mrf.mxu0 }
 0x4e1   : > { %v3815_v50 = vadd.f32 %v3801_v37, %v3677_v42 }
 0x4e2   : > { %v3666_v47 = vpop.f32.mrf.mxu0 }
 0x4e3   : > { %v3678_v48 = vadd.f32 %v3666_v47, %v3546_v34 }
 0x4e5   : > { %v3816_v52 = vadd.f32 %v3804_v49, %v3678_v48 }
 0x4f3   : > { %v5686_v53 = vpop.f32.mrf.mxu1 }
 0x4f5   : > { %v4063_v45 = vpop.f32.mrf.mxu1 }
 0x4f7   : > { %v5687_v14 = vpop.f32.mrf.mxu1 }
 0x4f9   : > { %v4066_v62 = vpop.f32.mrf.mxu1 }
 0x4fc   : > { %v5666_v55 = vpop.f32.mrf.mxu0 }
 0x4fd   : > { %v3941_v57 = vadd.f32 %v5666_v55, %v3817_v40 }
 0x4fe   : > { %v3925_v58 = vpop.f32.mrf.mxu0 }
 0x4ff   : > { %v3939_v59 = vadd.f32 %v3925_v58, %v3815_v50  ;;  %v4079_v51 = vadd.f32 %v5686_v53, %v3941_v57 }
 0x500   : > { %v5667_v56 = vpop.f32.mrf.mxu0 }
 0x501   : > { %v4077_v60 = vadd.f32 %v4063_v45, %v3939_v59 }
 0x502   : > { %v3928_v1 = vpop.f32.mrf.mxu0 }
 0x503   : > { %v3940_v4 = vadd.f32 %v3928_v1, %v3816_v52 }
 0x505   : > { %v4078_v46 = vadd.f32 %v4066_v62, %v3940_v4 }
 0x513   : > { %v5726_v24 = vpop.f32.mrf.mxu1 }
 0x515   : > { %v4325_v63 = vpop.f32.mrf.mxu1 }
 0x517   : > { %v5727_v61 = vpop.f32.mrf.mxu1 }
 0x519   : > { %v4328_v11 = vpop.f32.mrf.mxu1 }
 0x51c   : > { %v5706_v2 = vpop.f32.mrf.mxu0 }
 0x51d   : > { %v4203_v5 = vadd.f32 %v5706_v2, %v4079_v51 }
 0x51e   : > { %v4187_v3 = vpop.f32.mrf.mxu0 }
 0x51f   : > { %v4201_v7 = vadd.f32 %v4187_v3, %v4077_v60  ;;  %v4341_v8 = vadd.f32 %v5726_v24, %v4203_v5 }
 0x520   : > { %v5707_v15 = vpop.f32.mrf.mxu0 }
 0x521   : > { %v4339_v19 = vadd.f32 %v4325_v63, %v4201_v7 }
 0x522   : > { %v4190_v6 = vpop.f32.mrf.mxu0 }
 0x523   : > { %v4202_v54 = vadd.f32 %v4190_v6, %v4078_v46 }
 0x525   : > { %v4340_v18 = vadd.f32 %v4328_v11, %v4202_v54 }
 0x53c   : > { %v5746_v36 = vpop.f32.mrf.mxu0 }
 0x53d   : > { %v4460_v10 = vadd.f32 %v5746_v36, %v4341_v8 }
 0x53e   : > { %v4444_v12 = vpop.f32.mrf.mxu0 }
 0x53f   : > { %v4470_v16 = vadd.f32 %v4854_v9, %v4460_v10  ;;  %v4458_v21 = vadd.f32 %v4444_v12, %v4339_v19 }
 0x540   : > { %v5747_v20 = vpop.f32.mrf.mxu0 }
 0x541   : > { %v4872_v17 = vpack.c.bf16 %v4470_v16, %v4470_v16  ;;  %v4468_v27 = vadd.f32 %v4854_v9, %v4458_v21 }
 0x542   : > { %v4447_v13 = vpop.f32.mrf.mxu0 }
 0x543   : > { %4486 = vst [vmem:[%s347_s23 + $0x8] sm:$0xf] %v4872_v17  ;;  %v4459_v22 = vadd.f32 %v4447_v13, %v4340_v18 }
 0x545   : > { %v4469_v32 = vadd.f32 %v4854_v9, %v4459_v22 }
 0x547   : > { %v4876_v0 = vpack.c.bf16 %v4469_v32, %v4468_v27 }
 0x549   : > { %4877 = vst [vmem:[%s347_s23] sm:$0xff] %v4876_v0  }
 0x54a PF: > { %s20_s30 = sadd.s32 1, %s6072_s30  }
 0x54b   : > { %p17_p1 = scmp.ge.s32.totalorder %s20_s30, 4  }
 0x54d   :  { %19 = sbr.rel (!%p17_p1) target bundleno = 1 (0x1), region = 91 }
 0x552   :  { %4508 = vsyncpa [#allocation4], 1 }
 0x553   :  { %4510 = vsyncpa [#allocation4 + $0x1], 1 }

</bundles_post_ra>
